<compile_context>
chip_gen: v7x
topology: tpu7x:2x2x1
jax: 0.10.0
libtpu: 0.0.40
codegen_flags: <defaults>
</compile_context>

<pallas_src>
import functools

import jax
import jax.numpy as jnp
from jax.experimental import pallas as pl
from jax.experimental.pallas import tpu as pltpu

INPUT_SIZE = 784
HIDDEN_SIZE = 400
OUT_SIZE = 10

# Padded, 128-multiple dims used inside the kernel.
IN_PAD = 896    # 7 * 128
HID_PAD = 512   # 4 * 128
OUT_PAD = 128   # 1 * 128


def _round_up(x, m):
    return (x + m - 1) // m * m


def mlp_kernel(x_ref, w1_ref, b1_ref, w2_ref, b2_ref, w3_ref, b3_ref, o_ref):
    # Load the f32 biases once per batch tile (broadcast hoisted out of any
    # future inner loops).
    b1 = b1_ref[...]
    b2 = b2_ref[...]
    b3 = b3_ref[...]

    # Layer 1: Linear(896 -> 512) + ReLU. bf16 operands, f32 MXU accumulation.
    h1 = jnp.dot(x_ref[...], w1_ref[...], preferred_element_type=jnp.float32)
    h1 = jnp.maximum(h1 + b1, 0.0).astype(jnp.bfloat16)

    # Layer 2: Linear(512 -> 512) + ReLU.
    h2 = jnp.dot(h1, w2_ref[...], preferred_element_type=jnp.float32)
    h2 = jnp.maximum(h2 + b2, 0.0).astype(jnp.bfloat16)

    # Layer 3: Linear(512 -> 128), no activation; f32 output (lane-dense store).
    out = jnp.dot(h2, w3_ref[...], preferred_element_type=jnp.float32)
    o_ref[...] = out + b3


def _pad_params(w1, b1, w2, b2, w3, b3):
    # Zero-pad to the 128-multiple layout; weights cast to bf16 (MXU operands),
    # biases kept f32 (VPU epilogue). Padded rows/cols are zero so they
    # contribute nothing and padded outputs are sliced off by the wrapper.
    w1p = jnp.pad(w1, ((0, IN_PAD - INPUT_SIZE), (0, HID_PAD - HIDDEN_SIZE))).astype(jnp.bfloat16)
    b1p = jnp.pad(b1, ((0, 0), (0, HID_PAD - HIDDEN_SIZE))).astype(jnp.float32)
    w2p = jnp.pad(w2, ((0, HID_PAD - HIDDEN_SIZE), (0, HID_PAD - HIDDEN_SIZE))).astype(jnp.bfloat16)
    b2p = jnp.pad(b2, ((0, 0), (0, HID_PAD - HIDDEN_SIZE))).astype(jnp.float32)
    w3p = jnp.pad(w3, ((0, HID_PAD - HIDDEN_SIZE), (0, OUT_PAD - OUT_SIZE))).astype(jnp.bfloat16)
    b3p = jnp.pad(b3, ((0, 0), (0, OUT_PAD - OUT_SIZE))).astype(jnp.float32)
    return w1p, b1p, w2p, b2p, w3p, b3p


@functools.partial(jax.jit, static_argnames=("block_b",))
def neural_net_forward(x, w1, b1, w2, b2, w3, b3, block_b=256):
    """x: [B, 784] f32; weights stored as [in, out]; biases as [1, out]."""
    B = x.shape[0]
    # Batch tile: up to `block_b` rows (MXU M-dim multiple), at least an
    # 8-sublane-aligned tile for tiny batches.
    tb = min(block_b, _round_up(B, 8))
    b_pad = _round_up(B, tb)

    xp = jnp.pad(x, ((0, b_pad - B), (0, IN_PAD - INPUT_SIZE))).astype(jnp.bfloat16)
    w1p, b1p, w2p, b2p, w3p, b3p = _pad_params(w1, b1, w2, b2, w3, b3)

    def resident(shape):
        # Whole array, same block for every grid step -> stays resident in VMEM.
        return pl.BlockSpec(shape, lambda i: (0,) * len(shape))

    out_padded = pl.pallas_call(
        mlp_kernel,
        out_shape=jax.ShapeDtypeStruct((b_pad, OUT_PAD), jnp.float32),
        grid=(b_pad // tb,),
        in_specs=[
            pl.BlockSpec((tb, IN_PAD), lambda i: (i, 0)),   # x: batch-tiled
            resident((IN_PAD, HID_PAD)),                    # w1
            resident((1, HID_PAD)),                         # b1
            resident((HID_PAD, HID_PAD)),                   # w2
            resident((1, HID_PAD)),                         # b2
            resident((HID_PAD, OUT_PAD)),                   # w3
            resident((1, OUT_PAD)),                         # b3
        ],
        out_specs=pl.BlockSpec((tb, OUT_PAD), lambda i: (i, 0)),
        compiler_params=pltpu.CompilerParams(
            dimension_semantics=("parallel",),
        ),
    )(xp, w1p, b1p, w2p, b2p, w3p, b3p)

    return out_padded[:B, :OUT_SIZE]


def init_params(key):
    # Deterministic synthetic init (PyTorch-Linear-style uniform bounds).
    keys = jax.random.split(key, 6)

    def uniform(k, shape, fan_in):
        bound = 1.0 / jnp.sqrt(fan_in)
        return jax.random.uniform(k, shape, jnp.float32, -bound, bound)

    w1 = uniform(keys[0], (INPUT_SIZE, HIDDEN_SIZE), INPUT_SIZE)
    b1 = uniform(keys[1], (1, HIDDEN_SIZE), INPUT_SIZE)
    w2 = uniform(keys[2], (HIDDEN_SIZE, HIDDEN_SIZE), HIDDEN_SIZE)
    b2 = uniform(keys[3], (1, HIDDEN_SIZE), HIDDEN_SIZE)
    w3 = uniform(keys[4], (HIDDEN_SIZE, OUT_SIZE), HIDDEN_SIZE)
    b3 = uniform(keys[5], (1, OUT_SIZE), HIDDEN_SIZE)
    return w1, b1, w2, b2, w3, b3


def reference_forward(x, w1, b1, w2, b2, w3, b3):
    # Pure-JAX reference mirroring the kernel's bf16-operand / f32-accumulate math.
    h1 = jnp.dot(x.astype(jnp.bfloat16), w1.astype(jnp.bfloat16),
                 preferred_element_type=jnp.float32) + b1
    h1 = jnp.maximum(h1, 0.0).astype(jnp.bfloat16)
    h2 = jnp.dot(h1, w2.astype(jnp.bfloat16),
                 preferred_element_type=jnp.float32) + b2
    h2 = jnp.maximum(h2, 0.0).astype(jnp.bfloat16)
    return jnp.dot(h2, w3.astype(jnp.bfloat16),
                   preferred_element_type=jnp.float32) + b3


if __name__ == "__main__":
    key = jax.random.PRNGKey(0)
    k_x, k_p = jax.random.split(key)

    batch = 8
    x = jax.random.normal(k_x, (batch, INPUT_SIZE), dtype=jnp.float32)
    w1, b1, w2, b2, w3, b3 = init_params(k_p)

    out = neural_net_forward(x, w1, b1, w2, b2, w3, b3)
    out = jax.block_until_ready(out)

    ref = reference_forward(x, w1, b1, w2, b2, w3, b3)
    assert out.shape == (batch, OUT_SIZE)
    assert jnp.allclose(out, ref, atol=1e-2, rtol=1e-2), (
        float(jnp.max(jnp.abs(out - ref))))

    print("KERNEL_OK")
</pallas_src>

<mosaic_0001>
module attributes {stable_mosaic.version = 11 : i64} {
  func.func @mlp_kernel(%arg0: i32, %arg1: memref<8x896xbf16, #tpu.memory_space<vmem>>, %arg2: memref<896x512xbf16, #tpu.memory_space<vmem>>, %arg3: memref<1x512xf32, #tpu.memory_space<vmem>>, %arg4: memref<512x512xbf16, #tpu.memory_space<vmem>>, %arg5: memref<1x512xf32, #tpu.memory_space<vmem>>, %arg6: memref<512x128xbf16, #tpu.memory_space<vmem>>, %arg7: memref<1x128xf32, #tpu.memory_space<vmem>>, %arg8: memref<8x128xf32, #tpu.memory_space<vmem>>) attributes {dimension_semantics = [#tpu.dimension_semantics<parallel>], iteration_bounds = array<i64: 1>, scalar_prefetch = 0 : i64, scratch_operands = 0 : i64, tpu.core_type = #tpu.core_type<tc>, window_params = [{transform_indices = @transform_0, window_bounds = array<i64: 8, 896>}, {pipeline_mode = #tpu.pipeline_mode<synchronous>, transform_indices = @transform_1, window_bounds = array<i64: 896, 512>}, {pipeline_mode = #tpu.pipeline_mode<synchronous>, transform_indices = @transform_2, window_bounds = array<i64: 1, 512>}, {pipeline_mode = #tpu.pipeline_mode<synchronous>, transform_indices = @transform_3, window_bounds = array<i64: 512, 512>}, {pipeline_mode = #tpu.pipeline_mode<synchronous>, transform_indices = @transform_4, window_bounds = array<i64: 1, 512>}, {pipeline_mode = #tpu.pipeline_mode<synchronous>, transform_indices = @transform_5, window_bounds = array<i64: 512, 128>}, {pipeline_mode = #tpu.pipeline_mode<synchronous>, transform_indices = @transform_6, window_bounds = array<i64: 1, 128>}, {transform_indices = @transform_7, window_bounds = array<i64: 8, 128>}]} {
    %c0 = arith.constant 0 : index
    %c0_0 = arith.constant 0 : index
    %0 = vector.load %arg3[%c0, %c0_0] : memref<1x512xf32, #tpu.memory_space<vmem>>, vector<1x512xf32>
    %c0_1 = arith.constant 0 : index
    %c0_2 = arith.constant 0 : index
    %1 = vector.load %arg5[%c0_1, %c0_2] : memref<1x512xf32, #tpu.memory_space<vmem>>, vector<1x512xf32>
    %c0_3 = arith.constant 0 : index
    %c0_4 = arith.constant 0 : index
    %2 = vector.load %arg7[%c0_3, %c0_4] : memref<1x128xf32, #tpu.memory_space<vmem>>, vector<1x128xf32>
    %c0_5 = arith.constant 0 : index
    %c0_6 = arith.constant 0 : index
    %3 = vector.load %arg1[%c0_5, %c0_6] : memref<8x896xbf16, #tpu.memory_space<vmem>>, vector<8x896xbf16>
    %c0_7 = arith.constant 0 : index
    %c0_8 = arith.constant 0 : index
    %4 = vector.load %arg2[%c0_7, %c0_8] : memref<896x512xbf16, #tpu.memory_space<vmem>>, vector<896x512xbf16>
    %cst = arith.constant dense<0.000000e+00> : vector<8x512xf32>
    %5 = tpu.matmul %3, %4, %cst {dimension_numbers = #tpu.dot_dimension_numbers<[1], [0], [0], [1], [0, 0, 1, 1], [], []>} : vector<8x896xbf16>, vector<896x512xbf16>, vector<8x512xf32> -> vector<8x512xf32>
    %6 = vector.broadcast %0 : vector<1x512xf32> to vector<8x512xf32>
    %7 = arith.addf %5, %6 : vector<8x512xf32>
    %cst_9 = arith.constant 0.000000e+00 : f32
    %8 = vector.broadcast %cst_9 : f32 to vector<8x512xf32>
    %9 = arith.maximumf %7, %8 : vector<8x512xf32>
    %10 = arith.truncf %9 : vector<8x512xf32> to vector<8x512xbf16>
    %c0_10 = arith.constant 0 : index
    %c0_11 = arith.constant 0 : index
    %11 = vector.load %arg4[%c0_10, %c0_11] : memref<512x512xbf16, #tpu.memory_space<vmem>>, vector<512x512xbf16>
    %cst_12 = arith.constant dense<0.000000e+00> : vector<8x512xf32>
    %12 = tpu.matmul %10, %11, %cst_12 {dimension_numbers = #tpu.dot_dimension_numbers<[1], [0], [0], [1], [0, 0, 1, 1], [], []>} : vector<8x512xbf16>, vector<512x512xbf16>, vector<8x512xf32> -> vector<8x512xf32>
    %13 = vector.broadcast %1 : vector<1x512xf32> to vector<8x512xf32>
    %14 = arith.addf %12, %13 : vector<8x512xf32>
    %cst_13 = arith.constant 0.000000e+00 : f32
    %15 = vector.broadcast %cst_13 : f32 to vector<8x512xf32>
    %16 = arith.maximumf %14, %15 : vector<8x512xf32>
    %17 = arith.truncf %16 : vector<8x512xf32> to vector<8x512xbf16>
    %c0_14 = arith.constant 0 : index
    %c0_15 = arith.constant 0 : index
    %18 = vector.load %arg6[%c0_14, %c0_15] : memref<512x128xbf16, #tpu.memory_space<vmem>>, vector<512x128xbf16>
    %cst_16 = arith.constant dense<0.000000e+00> : vector<8x128xf32>
    %19 = tpu.matmul %17, %18, %cst_16 {dimension_numbers = #tpu.dot_dimension_numbers<[1], [0], [0], [1], [0, 0, 1, 1], [], []>} : vector<8x512xbf16>, vector<512x128xbf16>, vector<8x128xf32> -> vector<8x128xf32>
    %20 = vector.broadcast %2 : vector<1x128xf32> to vector<8x128xf32>
    %21 = arith.addf %19, %20 : vector<8x128xf32>
    %c0_17 = arith.constant 0 : index
    %c0_18 = arith.constant 0 : index
    %22 = vector.load %arg8[%c0_17, %c0_18] : memref<8x128xf32, #tpu.memory_space<vmem>>, vector<8x128xf32>
    tpu.vector_store %arg8[%c0_17, %c0_18], %21 {strides = array<i32>} : memref<8x128xf32, #tpu.memory_space<vmem>>, vector<8x128xf32>,
    return
  }
  func.func @transform_0(%arg0: i32) -> (i32, i32) {
    %c0_i32 = arith.constant 0 : i32
    %c0_i32_0 = arith.constant 0 : i32
    return %arg0, %c0_i32 : i32, i32
  }
  func.func @transform_1(%arg0: i32) -> (i32, i32) {
    %c0_i32 = arith.constant 0 : i32
    %c0_i32_0 = arith.constant 0 : i32
    %c0_i32_1 = arith.constant 0 : i32
    return %c0_i32, %c0_i32_0 : i32, i32
  }
  func.func @transform_2(%arg0: i32) -> (i32, i32) {
    %c0_i32 = arith.constant 0 : i32
    %c0_i32_0 = arith.constant 0 : i32
    %c0_i32_1 = arith.constant 0 : i32
    return %c0_i32, %c0_i32_0 : i32, i32
  }
  func.func @transform_3(%arg0: i32) -> (i32, i32) {
    %c0_i32 = arith.constant 0 : i32
    %c0_i32_0 = arith.constant 0 : i32
    %c0_i32_1 = arith.constant 0 : i32
    return %c0_i32, %c0_i32_0 : i32, i32
  }
  func.func @transform_4(%arg0: i32) -> (i32, i32) {
    %c0_i32 = arith.constant 0 : i32
    %c0_i32_0 = arith.constant 0 : i32
    %c0_i32_1 = arith.constant 0 : i32
    return %c0_i32, %c0_i32_0 : i32, i32
  }
  func.func @transform_5(%arg0: i32) -> (i32, i32) {
    %c0_i32 = arith.constant 0 : i32
    %c0_i32_0 = arith.constant 0 : i32
    %c0_i32_1 = arith.constant 0 : i32
    return %c0_i32, %c0_i32_0 : i32, i32
  }
  func.func @transform_6(%arg0: i32) -> (i32, i32) {
    %c0_i32 = arith.constant 0 : i32
    %c0_i32_0 = arith.constant 0 : i32
    %c0_i32_1 = arith.constant 0 : i32
    return %c0_i32, %c0_i32_0 : i32, i32
  }
  func.func @transform_7(%arg0: i32) -> (i32, i32) {
    %c0_i32 = arith.constant 0 : i32
    %c0_i32_0 = arith.constant 0 : i32
    return %arg0, %c0_i32 : i32, i32
  }
}

</mosaic_0001>

<bundles_post_ra>
// kernel: neural_net_forward.1
= control target key start
LH: loop header
LB: loop body
LE: loop exit
PB: predicated region body
PF: predicated region fallthrough
CT: control target
= control target key end

     0   :  { %s5418_s0 = inlined_call_operand.vmem [shape: bf16[8,896], index: 0, kind: input, shape index: {}]   ;;  %s5419_s1 = inlined_call_operand.vmem [shape: bf16[896,512], index: 1, kind: input, shape index: {}]   ;;  %s5420_s2 = inlined_call_operand.vmem [shape: f32[1,512], index: 2, kind: input, shape index: {}]   ;;  %s5421_s3 = inlined_call_operand.vmem [shape: bf16[512,512], index: 3, kind: input, shape index: {}]   ;;  %s5422_s4 = inlined_call_operand.vmem [shape: f32[1,512], index: 4, kind: input, shape index: {}]   ;;  %s5423_s5 = inlined_call_operand.vmem [shape: bf16[512,128], index: 5, kind: input, shape index: {}]   ;;  %s5424_s6 = inlined_call_operand.vmem [shape: f32[1,128], index: 6, kind: input, shape index: {}]   ;;  %s5425_s7 = inlined_call_operand.hbm [shape: f32[8,128], index: 7, kind: output, shape index: {}]  }
   0x1   :  { %v3557_v0 = vld [vmem:[%s5419_s1 + $0x4] ss:$16 sps:$4 sm:$0xff]   ;;  %v3559_v1 = vld [vmem:[%s5419_s1 + $0xc] ss:$16 sps:$4 sm:$0xff]   ;;  %v3561_v2 = vld [vmem:[%s5419_s1] ss:$16 sps:$4 sm:$0xff]  }
   0x2   :  { %1425 = vmatprep.subr.bf16.mxu0 %v3557_v0  ;;  %v3562_v3 = vld [vmem:[%s5419_s1 + $0x8] ss:$16 sps:$4 sm:$0xff]   ;;  %1589 = vmatprep.subr.bf16.mxu1 %v3559_v1  ;;  %v3563_v4 = vld [vmem:[%s5419_s1 + $0x24] ss:$16 sps:$4 sm:$0xff]   ;;  %v3565_v5 = vld [vmem:[%s5419_s1 + $0x2c] ss:$16 sps:$4 sm:$0xff]  }
   0x3   :  { %1426 = vmatpush1.bf16.msra.mxu0 %v3561_v2  ;;  %1590 = vmatpush1.bf16.msra.mxu1 %v3562_v3  ;;  %v3567_v6 = vld [vmem:[%s5419_s1 + $0x20] ss:$16 sps:$4 sm:$0xff]   ;;  %v3568_v7 = vld [vmem:[%s5419_s1 + $0x28] ss:$16 sps:$4 sm:$0xff]   ;;  %v3569_v8 = vld [vmem:[%s5419_s1 + $0x44] ss:$16 sps:$4 sm:$0xff]  }
   0x4   :  { %1427 = vmatprep.subr.bf16.mxu0 %v3563_v4  ;;  %1591 = vmatprep.subr.bf16.mxu1 %v3565_v5  ;;  %v3571_v9 = vld [vmem:[%s5419_s1 + $0x4c] ss:$16 sps:$4 sm:$0xff]   ;;  %v3573_v10 = vld [vmem:[%s5419_s1 + $0x40] ss:$16 sps:$4 sm:$0xff]   ;;  %v3574_v11 = vld [vmem:[%s5419_s1 + $0x48] ss:$16 sps:$4 sm:$0xff]  }
   0x5   :  { %v3575_v12 = vld [vmem:[%s5419_s1 + $0x64] ss:$16 sps:$4 sm:$0xff]   ;;  %v3577_v13 = vld [vmem:[%s5419_s1 + $0x6c] ss:$16 sps:$4 sm:$0xff]   ;;  %v3579_v14 = vld [vmem:[%s5419_s1 + $0x60] ss:$16 sps:$4 sm:$0xff]  }
   0x6   :  { %v3580_v15 = vld [vmem:[%s5419_s1 + $0x68] ss:$16 sps:$4 sm:$0xff]   ;;  %v3581_v16 = vld [vmem:[%s5419_s1 + $0x84] ss:$16 sps:$4 sm:$0xff]   ;;  %v3583_v17 = vld [vmem:[%s5419_s1 + $0x8c] ss:$16 sps:$4 sm:$0xff]  }
   0x7   :  { %1428 = vmatpush1.bf16.msra.mxu0 %v3567_v6  ;;  %1592 = vmatpush1.bf16.msra.mxu1 %v3568_v7  ;;  %v3585_v18 = vld [vmem:[%s5419_s1 + $0x80] ss:$16 sps:$4 sm:$0xff]   ;;  %v3586_v19 = vld [vmem:[%s5419_s1 + $0x88] ss:$16 sps:$4 sm:$0xff]   ;;  %v3587_v20 = vld [vmem:[%s5419_s1 + $0xa4] ss:$16 sps:$4 sm:$0xff]  }
   0x8   :  { %1429 = vmatprep.subr.bf16.mxu0 %v3569_v8  ;;  %1593 = vmatprep.subr.bf16.mxu1 %v3571_v9  ;;  %v3589_v21 = vld [vmem:[%s5419_s1 + $0xac] ss:$16 sps:$4 sm:$0xff]   ;;  %v3591_v22 = vld [vmem:[%s5419_s1 + $0xa0] ss:$16 sps:$4 sm:$0xff]   ;;  %v3592_v23 = vld [vmem:[%s5419_s1 + $0xa8] ss:$16 sps:$4 sm:$0xff]  }
   0x9   :  { %v3593_v24 = vld [vmem:[%s5419_s1 + $0xc4] ss:$16 sps:$4 sm:$0xff]   ;;  %v3595_v25 = vld [vmem:[%s5419_s1 + $0xcc] ss:$16 sps:$4 sm:$0xff]   ;;  %v3597_v26 = vld [vmem:[%s5419_s1 + $0xc0] ss:$16 sps:$4 sm:$0xff]  }
   0xa   :  { %v3598_v27 = vld [vmem:[%s5419_s1 + $0xc8] ss:$16 sps:$4 sm:$0xff]   ;;  %v3599_v28 = vld [vmem:[%s5419_s1 + $0xe4] ss:$16 sps:$4 sm:$0xff]   ;;  %v3601_v29 = vld [vmem:[%s5419_s1 + $0xec] ss:$16 sps:$4 sm:$0xff]  }
   0xb   :  { %1430 = vmatpush1.bf16.msra.mxu0 %v3573_v10  ;;  %1594 = vmatpush1.bf16.msra.mxu1 %v3574_v11  ;;  %v3603_v30 = vld [vmem:[%s5419_s1 + $0xe0] ss:$16 sps:$4 sm:$0xff]   ;;  %v3604_v31 = vld [vmem:[%s5419_s1 + $0xe8] ss:$16 sps:$4 sm:$0xff]   ;;  %v3605_v32 = vld [vmem:[%s5419_s1 + $0x104] ss:$16 sps:$4 sm:$0xff]  }
   0xc   :  { %1431 = vmatprep.subr.bf16.mxu0 %v3575_v12  ;;  %1595 = vmatprep.subr.bf16.mxu1 %v3577_v13  ;;  %v3607_v33 = vld [vmem:[%s5419_s1 + $0x10c] ss:$16 sps:$4 sm:$0xff]   ;;  %v3609_v34 = vld [vmem:[%s5419_s1 + $0x100] ss:$16 sps:$4 sm:$0xff]   ;;  %v3610_v35 = vld [vmem:[%s5419_s1 + $0x108] ss:$16 sps:$4 sm:$0xff]  }
   0xd   :  { %v3611_v36 = vld [vmem:[%s5419_s1 + $0x124] ss:$16 sps:$4 sm:$0xff]   ;;  %v3613_v37 = vld [vmem:[%s5419_s1 + $0x12c] ss:$16 sps:$4 sm:$0xff]   ;;  %v3615_v38 = vld [vmem:[%s5419_s1 + $0x120] ss:$16 sps:$4 sm:$0xff]  }
   0xe   :  { %v3616_v39 = vld [vmem:[%s5419_s1 + $0x128] ss:$16 sps:$4 sm:$0xff]   ;;  %v3617_v40 = vld [vmem:[%s5419_s1 + $0x144] ss:$16 sps:$4 sm:$0xff]   ;;  %v3619_v41 = vld [vmem:[%s5419_s1 + $0x14c] ss:$16 sps:$4 sm:$0xff]  }
   0xf   :  { %1432 = vmatpush1.bf16.msra.mxu0 %v3579_v14  ;;  %1596 = vmatpush1.bf16.msra.mxu1 %v3580_v15  ;;  %v3621_v42 = vld [vmem:[%s5419_s1 + $0x140] ss:$16 sps:$4 sm:$0xff]   ;;  %v3622_v43 = vld [vmem:[%s5419_s1 + $0x148] ss:$16 sps:$4 sm:$0xff]   ;;  %v3623_v44 = vld [vmem:[%s5419_s1 + $0x164] ss:$16 sps:$4 sm:$0xff]  }
  0x10   :  { %1433 = vmatprep.subr.bf16.mxu0 %v3581_v16  ;;  %1597 = vmatprep.subr.bf16.mxu1 %v3583_v17  ;;  %v3625_v45 = vld [vmem:[%s5419_s1 + $0x16c] ss:$16 sps:$4 sm:$0xff]   ;;  %v31_v46 = vld [vmem:[%s5418_s0] sm:$0xff]  ;;  %v3628_v49 = vld [vmem:[%s5419_s1 + $0x168] ss:$16 sps:$4 sm:$0xff]  }
  0x11   :  { %v3627_v47 = vld [vmem:[%s5419_s1 + $0x160] ss:$16 sps:$4 sm:$0xff]   ;;  %v3080_v48 = vcombine.high %v31_v46, %v31_v46  ;;  %v3629_v50 = vld [vmem:[%s5419_s1 + $0x184] ss:$16 sps:$4 sm:$0xff]   ;;  %v3631_v51 = vld [vmem:[%s5419_s1 + $0x18c] ss:$16 sps:$4 sm:$0xff]   ;;  %v3079_v4 = vcombine.low %v31_v46, %v31_v46 }
  0x12   :  { %v3633_v52 = vld [vmem:[%s5419_s1 + $0x180] ss:$16 sps:$4 sm:$0xff]   ;;  %v3634_v53 = vld [vmem:[%s5419_s1 + $0x188] ss:$16 sps:$4 sm:$0xff]   ;;  %v3635_v54 = vld [vmem:[%s5419_s1 + $0x1a4] ss:$16 sps:$4 sm:$0xff]  }
  0x13   :  { %1434 = vmatpush1.bf16.msra.mxu0 %v3585_v18  ;;  %1598 = vmatpush1.bf16.msra.mxu1 %v3586_v19  ;;  %v3637_v55 = vld [vmem:[%s5419_s1 + $0x1ac] ss:$16 sps:$4 sm:$0xff]   ;;  %v3639_v56 = vld [vmem:[%s5419_s1 + $0x1a0] ss:$16 sps:$4 sm:$0xff]   ;;  %v3640_v57 = vld [vmem:[%s5419_s1 + $0x1a8] ss:$16 sps:$4 sm:$0xff]  }
  0x14   :  { %1435 = vmatprep.subr.bf16.mxu0 %v3587_v20  ;;  %1599 = vmatprep.subr.bf16.mxu1 %v3589_v21  ;;  %v3641_v58 = vld [vmem:[%s5419_s1 + $0x1c4] ss:$16 sps:$4 sm:$0xff]   ;;  %v3643_v59 = vld [vmem:[%s5419_s1 + $0x1cc] ss:$16 sps:$4 sm:$0xff]   ;;  %v3645_v60 = vld [vmem:[%s5419_s1 + $0x1c0] ss:$16 sps:$4 sm:$0xff]  }
  0x15   :  { %1457 = vmatprep.mubr.bf16.mxu0 %v3080_v48  ;;  %1621 = vmatprep.mubr.bf16.mxu1 %v3080_v48  ;;  %v3646_v61 = vld [vmem:[%s5419_s1 + $0x1c8] ss:$16 sps:$4 sm:$0xff]   ;;  %v3647_v62 = vld [vmem:[%s5419_s1 + $0x1e4] ss:$16 sps:$4 sm:$0xff]   ;;  %v3649_v63 = vld [vmem:[%s5419_s1 + $0x1ec] ss:$16 sps:$4 sm:$0xff]  }
  0x16   :  { %v3651_v0 = vld [vmem:[%s5419_s1 + $0x1e0] ss:$16 sps:$4 sm:$0xff]   ;;  %v3652_v1 = vld [vmem:[%s5419_s1 + $0x1e8] ss:$16 sps:$4 sm:$0xff]   ;;  %v3657_v2 = vld [vmem:[%s5419_s1 + $0x204] ss:$16 sps:$4 sm:$0xff]  }
  0x17   :  { %1436 = vmatpush1.bf16.msra.mxu0 %v3591_v22  ;;  %1600 = vmatpush1.bf16.msra.mxu1 %v3592_v23  ;;  %v3660_v3 = vld [vmem:[%s5419_s1 + $0x20c] ss:$16 sps:$4 sm:$0xff]   ;;  %v3655_v5 = vld [vmem:[%s5419_s1 + $0x200] ss:$16 sps:$4 sm:$0xff]   ;;  %v3658_v6 = vld [vmem:[%s5419_s1 + $0x208] ss:$16 sps:$4 sm:$0xff]  }
  0x18   :  { %1437 = vmatprep.subr.bf16.mxu0 %v3593_v24  ;;  %1601 = vmatprep.subr.bf16.mxu1 %v3595_v25  ;;  %v3663_v7 = vld [vmem:[%s5419_s1 + $0x224] ss:$16 sps:$4 sm:$0xff]   ;;  %v3666_v8 = vld [vmem:[%s5419_s1 + $0x22c] ss:$16 sps:$4 sm:$0xff]   ;;  %v3661_v9 = vld [vmem:[%s5419_s1 + $0x220] ss:$16 sps:$4 sm:$0xff]  }
  0x19   :  { %v3664_v10 = vld [vmem:[%s5419_s1 + $0x228] ss:$16 sps:$4 sm:$0xff]   ;;  %v3669_v11 = vld [vmem:[%s5419_s1 + $0x244] ss:$16 sps:$4 sm:$0xff]   ;;  %v3672_v12 = vld [vmem:[%s5419_s1 + $0x24c] ss:$16 sps:$4 sm:$0xff]  }
  0x1a   :  { %v3667_v13 = vld [vmem:[%s5419_s1 + $0x240] ss:$16 sps:$4 sm:$0xff]   ;;  %v3670_v14 = vld [vmem:[%s5419_s1 + $0x248] ss:$16 sps:$4 sm:$0xff]   ;;  %v3675_v15 = vld [vmem:[%s5419_s1 + $0x264] ss:$16 sps:$4 sm:$0xff]  }
  0x1b   :  { %1438 = vmatpush1.bf16.msra.mxu0 %v3597_v26  ;;  %1602 = vmatpush1.bf16.msra.mxu1 %v3598_v27  ;;  %v3678_v16 = vld [vmem:[%s5419_s1 + $0x26c] ss:$16 sps:$4 sm:$0xff]   ;;  %v3673_v17 = vld [vmem:[%s5419_s1 + $0x260] ss:$16 sps:$4 sm:$0xff]   ;;  %v3676_v18 = vld [vmem:[%s5419_s1 + $0x268] ss:$16 sps:$4 sm:$0xff]  }
  0x1c   :  { %1439 = vmatprep.subr.bf16.mxu0 %v3599_v28  ;;  %1603 = vmatprep.subr.bf16.mxu1 %v3601_v29  ;;  %v3681_v19 = vld [vmem:[%s5419_s1 + $0x284] ss:$16 sps:$4 sm:$0xff]   ;;  %v3684_v20 = vld [vmem:[%s5419_s1 + $0x28c] ss:$16 sps:$4 sm:$0xff]   ;;  %v3679_v21 = vld [vmem:[%s5419_s1 + $0x280] ss:$16 sps:$4 sm:$0xff]  }
  0x1d   :  { %v3682_v22 = vld [vmem:[%s5419_s1 + $0x288] ss:$16 sps:$4 sm:$0xff]   ;;  %v3687_v23 = vld [vmem:[%s5419_s1 + $0x2a4] ss:$16 sps:$4 sm:$0xff]   ;;  %v3690_v24 = vld [vmem:[%s5419_s1 + $0x2ac] ss:$16 sps:$4 sm:$0xff]  }
  0x1e   :  { %v3685_v25 = vld [vmem:[%s5419_s1 + $0x2a0] ss:$16 sps:$4 sm:$0xff]   ;;  %v3688_v26 = vld [vmem:[%s5419_s1 + $0x2a8] ss:$16 sps:$4 sm:$0xff]   ;;  %v3693_v27 = vld [vmem:[%s5419_s1 + $0x2c4] ss:$16 sps:$4 sm:$0xff]  }
  0x1f   :  { %1440 = vmatpush1.bf16.msra.mxu0 %v3603_v30  ;;  %1604 = vmatpush1.bf16.msra.mxu1 %v3604_v31  ;;  %v3696_v28 = vld [vmem:[%s5419_s1 + $0x2cc] ss:$16 sps:$4 sm:$0xff]   ;;  %v3691_v31 = vld [vmem:[%s5419_s1 + $0x2c0] ss:$16 sps:$4 sm:$0xff]   ;;  %v3718_v48 = vld [vmem:[%s5419_s1 + $0x348] ss:$16 sps:$4 sm:$0xff]  }
  0x20   :  { %1441 = vmatprep.subr.bf16.mxu0 %v3605_v32  ;;  %1605 = vmatprep.subr.bf16.mxu1 %v3607_v33  ;;  %v4466_v29 = vld [vmem:[%s5418_s0 + $0x8] sm:$0xff]  ;;  %v3699_v33 = vld [vmem:[%s5419_s1 + $0x2e4] ss:$16 sps:$4 sm:$0xff]  }
  0x21   :  { %v3082_v30 = vcombine.high %v4466_v29, %v4466_v29  ;;  %v3694_v32 = vld [vmem:[%s5419_s1 + $0x2c8] ss:$16 sps:$4 sm:$0xff]   ;;  %v3720_v46 = vld [vmem:[%s5419_s1 + $0x34c] ss:$16 sps:$4 sm:$0xff]  }
  0x23   :  { %1442 = vmatpush1.bf16.msra.mxu0 %v3609_v34  ;;  %1606 = vmatpush1.bf16.msra.mxu1 %v3610_v35  ;;  %v3702_v34 = vld [vmem:[%s5419_s1 + $0x2ec] ss:$16 sps:$4 sm:$0xff]   ;;  %v3697_v35 = vld [vmem:[%s5419_s1 + $0x2e0] ss:$16 sps:$4 sm:$0xff]  }
  0x24   :  { %1443 = vmatprep.subr.bf16.mxu0 %v3611_v36  ;;  %1607 = vmatprep.subr.bf16.mxu1 %v3613_v37  ;;  %v3700_v36 = vld [vmem:[%s5419_s1 + $0x2e8] ss:$16 sps:$4 sm:$0xff]   ;;  %v3705_v37 = vld [vmem:[%s5419_s1 + $0x304] ss:$16 sps:$4 sm:$0xff]  }
  0x27   :  { %1444 = vmatpush1.bf16.msra.mxu0 %v3615_v38  ;;  %1608 = vmatpush1.bf16.msra.mxu1 %v3616_v39  ;;  %v3708_v38 = vld [vmem:[%s5419_s1 + $0x30c] ss:$16 sps:$4 sm:$0xff]   ;;  %v3703_v39 = vld [vmem:[%s5419_s1 + $0x300] ss:$16 sps:$4 sm:$0xff]  }
  0x28   :  { %1445 = vmatprep.subr.bf16.mxu0 %v3617_v40  ;;  %1609 = vmatprep.subr.bf16.mxu1 %v3619_v41  ;;  %v3706_v40 = vld [vmem:[%s5419_s1 + $0x308] ss:$16 sps:$4 sm:$0xff]   ;;  %v3711_v41 = vld [vmem:[%s5419_s1 + $0x324] ss:$16 sps:$4 sm:$0xff]  }
  0x2b   :  { %1446 = vmatpush1.bf16.msra.mxu0 %v3621_v42  ;;  %1610 = vmatpush1.bf16.msra.mxu1 %v3622_v43  ;;  %v3714_v42 = vld [vmem:[%s5419_s1 + $0x32c] ss:$16 sps:$4 sm:$0xff]   ;;  %v3709_v43 = vld [vmem:[%s5419_s1 + $0x320] ss:$16 sps:$4 sm:$0xff]  }
  0x2c   :  { %1447 = vmatprep.subr.bf16.mxu0 %v3623_v44  ;;  %1611 = vmatprep.subr.bf16.mxu1 %v3625_v45  ;;  %v3712_v44 = vld [vmem:[%s5419_s1 + $0x328] ss:$16 sps:$4 sm:$0xff]   ;;  %v3717_v45 = vld [vmem:[%s5419_s1 + $0x344] ss:$16 sps:$4 sm:$0xff]  }
  0x2f   :  { %1448 = vmatpush1.bf16.msra.mxu0 %v3627_v47  ;;  %1612 = vmatpush1.bf16.msra.mxu1 %v3628_v49  ;;  %v3715_v47 = vld [vmem:[%s5419_s1 + $0x340] ss:$16 sps:$4 sm:$0xff]   ;;  %v3723_v49 = vld [vmem:[%s5419_s1 + $0x364] ss:$16 sps:$4 sm:$0xff]  }
  0x30   :  { %1449 = vmatprep.subr.bf16.mxu0 %v3629_v50  ;;  %1613 = vmatprep.subr.bf16.mxu1 %v3631_v51  ;;  %v3726_v50 = vld [vmem:[%s5419_s1 + $0x36c] ss:$16 sps:$4 sm:$0xff]   ;;  %v3721_v51 = vld [vmem:[%s5419_s1 + $0x360] ss:$16 sps:$4 sm:$0xff]  }
  0x33   :  { %1450 = vmatpush1.bf16.msra.mxu0 %v3633_v52  ;;  %1614 = vmatpush1.bf16.msra.mxu1 %v3634_v53  ;;  %v3724_v52 = vld [vmem:[%s5419_s1 + $0x368] ss:$16 sps:$4 sm:$0xff]   ;;  %v3729_v53 = vld [vmem:[%s5419_s1 + $0x384] ss:$16 sps:$4 sm:$0xff]  }
  0x34   :  { %1451 = vmatprep.subr.bf16.mxu0 %v3635_v54  ;;  %1615 = vmatprep.subr.bf16.mxu1 %v3637_v55  ;;  %v3732_v54 = vld [vmem:[%s5419_s1 + $0x38c] ss:$16 sps:$4 sm:$0xff]   ;;  %v3727_v55 = vld [vmem:[%s5419_s1 + $0x380] ss:$16 sps:$4 sm:$0xff]  }
  0x37   :  { %1452 = vmatpush1.bf16.msra.mxu0 %v3639_v56  ;;  %1616 = vmatpush1.bf16.msra.mxu1 %v3640_v57  ;;  %v3730_v56 = vld [vmem:[%s5419_s1 + $0x388] ss:$16 sps:$4 sm:$0xff]   ;;  %v3735_v57 = vld [vmem:[%s5419_s1 + $0x3a4] ss:$16 sps:$4 sm:$0xff]  }
  0x38   :  { %1453 = vmatprep.subr.bf16.mxu0 %v3641_v58  ;;  %1617 = vmatprep.subr.bf16.mxu1 %v3643_v59  ;;  %v3738_v58 = vld [vmem:[%s5419_s1 + $0x3ac] ss:$16 sps:$4 sm:$0xff]   ;;  %v3733_v59 = vld [vmem:[%s5419_s1 + $0x3a0] ss:$16 sps:$4 sm:$0xff]  }
  0x3b   :  { %1454 = vmatpush1.bf16.msra.mxu0 %v3645_v60  ;;  %1618 = vmatpush1.bf16.msra.mxu1 %v3646_v61  ;;  %v3736_v60 = vld [vmem:[%s5419_s1 + $0x3a8] ss:$16 sps:$4 sm:$0xff]   ;;  %v3741_v61 = vld [vmem:[%s5419_s1 + $0x3c4] ss:$16 sps:$4 sm:$0xff]  }
  0x3c   :  { %1455 = vmatprep.subr.bf16.mxu0 %v3647_v62  ;;  %1619 = vmatprep.subr.bf16.mxu1 %v3649_v63  ;;  %v3744_v62 = vld [vmem:[%s5419_s1 + $0x3cc] ss:$16 sps:$4 sm:$0xff]   ;;  %v3739_v63 = vld [vmem:[%s5419_s1 + $0x3c0] ss:$16 sps:$4 sm:$0xff]  }
  0x3f   :  { %1456 = vmatpush1.bf16.msra.mxu0 %v3651_v0  ;;  %1620 = vmatpush1.bf16.msra.mxu1 %v3652_v1  ;;  %v3742_v0 = vld [vmem:[%s5419_s1 + $0x3c8] ss:$16 sps:$4 sm:$0xff]   ;;  %v3747_v1 = vld [vmem:[%s5419_s1 + $0x3e4] ss:$16 sps:$4 sm:$0xff]  }
  0x40   :  { %1466 = vmatprep.subr.bf16.mxu0 %v3657_v2  ;;  %1630 = vmatprep.subr.bf16.mxu1 %v3660_v3  ;;  %v3750_v2 = vld [vmem:[%s5419_s1 + $0x3ec] ss:$16 sps:$4 sm:$0xff]   ;;  %v3745_v3 = vld [vmem:[%s5419_s1 + $0x3e0] ss:$16 sps:$4 sm:$0xff]  }
  0x42   :  { %1458 = vmatmul.mubr.bf16.vlgmr.msra.gmra.mrb[0].mxu0 %v3079_v4  ;;  %1622 = vmatmul.mubr.bf16.vlgmr.msra.gmra.mrb[0].mxu1 %v3079_v4  ;;  %v3748_v4 = vld [vmem:[%s5419_s1 + $0x3e8] ss:$16 sps:$4 sm:$0xff]  }
  0x43   :  { %1467 = vmatpush1.bf16.msra.mxu0 %v3655_v5  ;;  %1631 = vmatpush1.bf16.msra.mxu1 %v3658_v6  ;;  %v3755_v5 = vld [vmem:[%s5419_s1 + $0x404] ss:$16 sps:$4 sm:$0xff]   ;;  %v3758_v6 = vld [vmem:[%s5419_s1 + $0x40c] ss:$16 sps:$4 sm:$0xff]  }
  0x44   :  { %1468 = vmatprep.subr.bf16.mxu0 %v3663_v7  ;;  %1632 = vmatprep.subr.bf16.mxu1 %v3666_v8  ;;  %v3081_v7 = vcombine.low %v4466_v29, %v4466_v29  ;;  %v3753_v8 = vld [vmem:[%s5419_s1 + $0x400] ss:$16 sps:$4 sm:$0xff]   ;;  %v3788_v29 = vld [vmem:[%s5419_s1 + $0x4ac] ss:$16 sps:$4 sm:$0xff]  }
  0x45   :  { %1498 = vmatprep.mubr.bf16.mxu0 %v3082_v30  ;;  %1662 = vmatprep.mubr.bf16.mxu1 %v3082_v30  ;;  %v3783_v30 = vld [vmem:[%s5419_s1 + $0x4a0] ss:$16 sps:$4 sm:$0xff]  }
  0x47   :  { %1469 = vmatpush1.bf16.msra.mxu0 %v3661_v9  ;;  %1633 = vmatpush1.bf16.msra.mxu1 %v3664_v10  ;;  %v3756_v9 = vld [vmem:[%s5419_s1 + $0x408] ss:$16 sps:$4 sm:$0xff]   ;;  %v3761_v10 = vld [vmem:[%s5419_s1 + $0x424] ss:$16 sps:$4 sm:$0xff]  }
  0x48   :  { %1470 = vmatprep.subr.bf16.mxu0 %v3669_v11  ;;  %1634 = vmatprep.subr.bf16.mxu1 %v3672_v12  ;;  %v4604_v11 = vld [vmem:[%s5418_s0 + $0x10] sm:$0xff]  ;;  %v3764_v12 = vld [vmem:[%s5419_s1 + $0x42c] ss:$16 sps:$4 sm:$0xff]  }
  0x4b   :  { %1471 = vmatpush1.bf16.msra.mxu0 %v3667_v13  ;;  %1635 = vmatpush1.bf16.msra.mxu1 %v3670_v14  ;;  %v3084_v13 = vcombine.high %v4604_v11, %v4604_v11  ;;  %v3759_v14 = vld [vmem:[%s5419_s1 + $0x420] ss:$16 sps:$4 sm:$0xff]  }
  0x4c   :  { %1472 = vmatprep.subr.bf16.mxu0 %v3675_v15  ;;  %1636 = vmatprep.subr.bf16.mxu1 %v3678_v16  ;;  %v3762_v15 = vld [vmem:[%s5419_s1 + $0x428] ss:$16 sps:$4 sm:$0xff]   ;;  %v3767_v16 = vld [vmem:[%s5419_s1 + $0x444] ss:$16 sps:$4 sm:$0xff]  }
  0x4f   :  { %1473 = vmatpush1.bf16.msra.mxu0 %v3673_v17  ;;  %1637 = vmatpush1.bf16.msra.mxu1 %v3676_v18  ;;  %v3770_v17 = vld [vmem:[%s5419_s1 + $0x44c] ss:$16 sps:$4 sm:$0xff]   ;;  %v3765_v18 = vld [vmem:[%s5419_s1 + $0x440] ss:$16 sps:$4 sm:$0xff]  }
  0x50   :  { %1474 = vmatprep.subr.bf16.mxu0 %v3681_v19  ;;  %1638 = vmatprep.subr.bf16.mxu1 %v3684_v20  ;;  %v3768_v19 = vld [vmem:[%s5419_s1 + $0x448] ss:$16 sps:$4 sm:$0xff]   ;;  %v3773_v20 = vld [vmem:[%s5419_s1 + $0x464] ss:$16 sps:$4 sm:$0xff]  }
  0x53   :  { %1475 = vmatpush1.bf16.msra.mxu0 %v3679_v21  ;;  %1639 = vmatpush1.bf16.msra.mxu1 %v3682_v22  ;;  %v3776_v21 = vld [vmem:[%s5419_s1 + $0x46c] ss:$16 sps:$4 sm:$0xff]   ;;  %v3771_v22 = vld [vmem:[%s5419_s1 + $0x460] ss:$16 sps:$4 sm:$0xff]  }
  0x54   :  { %1476 = vmatprep.subr.bf16.mxu0 %v3687_v23  ;;  %1640 = vmatprep.subr.bf16.mxu1 %v3690_v24  ;;  %v3774_v23 = vld [vmem:[%s5419_s1 + $0x468] ss:$16 sps:$4 sm:$0xff]   ;;  %v3779_v24 = vld [vmem:[%s5419_s1 + $0x484] ss:$16 sps:$4 sm:$0xff]  }
  0x57   :  { %1477 = vmatpush1.bf16.msra.mxu0 %v3685_v25  ;;  %1641 = vmatpush1.bf16.msra.mxu1 %v3688_v26  ;;  %v3782_v25 = vld [vmem:[%s5419_s1 + $0x48c] ss:$16 sps:$4 sm:$0xff]   ;;  %v3777_v26 = vld [vmem:[%s5419_s1 + $0x480] ss:$16 sps:$4 sm:$0xff]  }
  0x58   :  { %1478 = vmatprep.subr.bf16.mxu0 %v3693_v27  ;;  %1642 = vmatprep.subr.bf16.mxu1 %v3696_v28  ;;  %v3780_v27 = vld [vmem:[%s5419_s1 + $0x488] ss:$16 sps:$4 sm:$0xff]   ;;  %v3785_v28 = vld [vmem:[%s5419_s1 + $0x4a4] ss:$16 sps:$4 sm:$0xff]  }
  0x5b   :  { %1479 = vmatpush1.bf16.msra.mxu0 %v3691_v31  ;;  %1643 = vmatpush1.bf16.msra.mxu1 %v3694_v32  ;;  %v3786_v31 = vld [vmem:[%s5419_s1 + $0x4a8] ss:$16 sps:$4 sm:$0xff]   ;;  %v3791_v32 = vld [vmem:[%s5419_s1 + $0x4c4] ss:$16 sps:$4 sm:$0xff]  }
  0x5c   :  { %1480 = vmatprep.subr.bf16.mxu0 %v3699_v33  ;;  %1644 = vmatprep.subr.bf16.mxu1 %v3702_v34  ;;  %v3794_v33 = vld [vmem:[%s5419_s1 + $0x4cc] ss:$16 sps:$4 sm:$0xff]   ;;  %v3789_v34 = vld [vmem:[%s5419_s1 + $0x4c0] ss:$16 sps:$4 sm:$0xff]  }
  0x5f   :  { %1481 = vmatpush1.bf16.msra.mxu0 %v3697_v35  ;;  %1645 = vmatpush1.bf16.msra.mxu1 %v3700_v36  ;;  %v3792_v35 = vld [vmem:[%s5419_s1 + $0x4c8] ss:$16 sps:$4 sm:$0xff]   ;;  %v3797_v36 = vld [vmem:[%s5419_s1 + $0x4e4] ss:$16 sps:$4 sm:$0xff]  }
  0x60   :  { %1482 = vmatprep.subr.bf16.mxu0 %v3705_v37  ;;  %1646 = vmatprep.subr.bf16.mxu1 %v3708_v38  ;;  %v3800_v37 = vld [vmem:[%s5419_s1 + $0x4ec] ss:$16 sps:$4 sm:$0xff]   ;;  %v3795_v38 = vld [vmem:[%s5419_s1 + $0x4e0] ss:$16 sps:$4 sm:$0xff]  }
  0x63   :  { %1483 = vmatpush1.bf16.msra.mxu0 %v3703_v39  ;;  %1647 = vmatpush1.bf16.msra.mxu1 %v3706_v40  ;;  %v3798_v39 = vld [vmem:[%s5419_s1 + $0x4e8] ss:$16 sps:$4 sm:$0xff]   ;;  %v3803_v40 = vld [vmem:[%s5419_s1 + $0x504] ss:$16 sps:$4 sm:$0xff]  }
  0x64   :  { %1484 = vmatprep.subr.bf16.mxu0 %v3711_v41  ;;  %1648 = vmatprep.subr.bf16.mxu1 %v3714_v42  ;;  %v3806_v41 = vld [vmem:[%s5419_s1 + $0x50c] ss:$16 sps:$4 sm:$0xff]   ;;  %v3801_v42 = vld [vmem:[%s5419_s1 + $0x500] ss:$16 sps:$4 sm:$0xff]  }
  0x67   :  { %1485 = vmatpush1.bf16.msra.mxu0 %v3709_v43  ;;  %1649 = vmatpush1.bf16.msra.mxu1 %v3712_v44  ;;  %v3804_v43 = vld [vmem:[%s5419_s1 + $0x508] ss:$16 sps:$4 sm:$0xff]   ;;  %v3809_v44 = vld [vmem:[%s5419_s1 + $0x524] ss:$16 sps:$4 sm:$0xff]  }
  0x68   :  { %1486 = vmatprep.subr.bf16.mxu0 %v3717_v45  ;;  %1650 = vmatprep.subr.bf16.mxu1 %v3720_v46  ;;  %v3812_v45 = vld [vmem:[%s5419_s1 + $0x52c] ss:$16 sps:$4 sm:$0xff]   ;;  %v3807_v46 = vld [vmem:[%s5419_s1 + $0x520] ss:$16 sps:$4 sm:$0xff]  }
  0x6b   :  { %1487 = vmatpush1.bf16.msra.mxu0 %v3715_v47  ;;  %1651 = vmatpush1.bf16.msra.mxu1 %v3718_v48  ;;  %v3810_v47 = vld [vmem:[%s5419_s1 + $0x528] ss:$16 sps:$4 sm:$0xff]   ;;  %v3815_v48 = vld [vmem:[%s5419_s1 + $0x544] ss:$16 sps:$4 sm:$0xff]  }
  0x6c   :  { %1488 = vmatprep.subr.bf16.mxu0 %v3723_v49  ;;  %1652 = vmatprep.subr.bf16.mxu1 %v3726_v50  ;;  %v3818_v49 = vld [vmem:[%s5419_s1 + $0x54c] ss:$16 sps:$4 sm:$0xff]   ;;  %v3813_v50 = vld [vmem:[%s5419_s1 + $0x540] ss:$16 sps:$4 sm:$0xff]  }
  0x6f   :  { %1489 = vmatpush1.bf16.msra.mxu0 %v3721_v51  ;;  %1653 = vmatpush1.bf16.msra.mxu1 %v3724_v52  ;;  %v3816_v51 = vld [vmem:[%s5419_s1 + $0x548] ss:$16 sps:$4 sm:$0xff]   ;;  %v3821_v52 = vld [vmem:[%s5419_s1 + $0x564] ss:$16 sps:$4 sm:$0xff]  }
  0x70   :  { %1490 = vmatprep.subr.bf16.mxu0 %v3729_v53  ;;  %1654 = vmatprep.subr.bf16.mxu1 %v3732_v54  ;;  %v3824_v53 = vld [vmem:[%s5419_s1 + $0x56c] ss:$16 sps:$4 sm:$0xff]   ;;  %v3819_v54 = vld [vmem:[%s5419_s1 + $0x560] ss:$16 sps:$4 sm:$0xff]  }
  0x73   :  { %1491 = vmatpush1.bf16.msra.mxu0 %v3727_v55  ;;  %1655 = vmatpush1.bf16.msra.mxu1 %v3730_v56  ;;  %v3822_v55 = vld [vmem:[%s5419_s1 + $0x568] ss:$16 sps:$4 sm:$0xff]   ;;  %v3827_v56 = vld [vmem:[%s5419_s1 + $0x584] ss:$16 sps:$4 sm:$0xff]  }
  0x74   :  { %1492 = vmatprep.subr.bf16.mxu0 %v3735_v57  ;;  %1656 = vmatprep.subr.bf16.mxu1 %v3738_v58  ;;  %v3830_v57 = vld [vmem:[%s5419_s1 + $0x58c] ss:$16 sps:$4 sm:$0xff]   ;;  %v3825_v58 = vld [vmem:[%s5419_s1 + $0x580] ss:$16 sps:$4 sm:$0xff]  }
  0x77   :  { %1493 = vmatpush1.bf16.msra.mxu0 %v3733_v59  ;;  %1657 = vmatpush1.bf16.msra.mxu1 %v3736_v60  ;;  %v3828_v59 = vld [vmem:[%s5419_s1 + $0x588] ss:$16 sps:$4 sm:$0xff]   ;;  %v3833_v60 = vld [vmem:[%s5419_s1 + $0x5a4] ss:$16 sps:$4 sm:$0xff]  }
  0x78   :  { %1494 = vmatprep.subr.bf16.mxu0 %v3741_v61  ;;  %1658 = vmatprep.subr.bf16.mxu1 %v3744_v62  ;;  %v3836_v61 = vld [vmem:[%s5419_s1 + $0x5ac] ss:$16 sps:$4 sm:$0xff]   ;;  %v3831_v62 = vld [vmem:[%s5419_s1 + $0x5a0] ss:$16 sps:$4 sm:$0xff]  }
  0x7b   :  { %1495 = vmatpush1.bf16.msra.mxu0 %v3739_v63  ;;  %1659 = vmatpush1.bf16.msra.mxu1 %v3742_v0  ;;  %v3834_v63 = vld [vmem:[%s5419_s1 + $0x5a8] ss:$16 sps:$4 sm:$0xff]   ;;  %v3839_v0 = vld [vmem:[%s5419_s1 + $0x5c4] ss:$16 sps:$4 sm:$0xff]  }
  0x7c   :  { %1496 = vmatprep.subr.bf16.mxu0 %v3747_v1  ;;  %1660 = vmatprep.subr.bf16.mxu1 %v3750_v2  ;;  %v3842_v1 = vld [vmem:[%s5419_s1 + $0x5cc] ss:$16 sps:$4 sm:$0xff]   ;;  %v3837_v2 = vld [vmem:[%s5419_s1 + $0x5c0] ss:$16 sps:$4 sm:$0xff]  }
  0x7f   :  { %1497 = vmatpush1.bf16.msra.mxu0 %v3745_v3  ;;  %1661 = vmatpush1.bf16.msra.mxu1 %v3748_v4  ;;  %v3840_v3 = vld [vmem:[%s5419_s1 + $0x5c8] ss:$16 sps:$4 sm:$0xff]   ;;  %v3845_v4 = vld [vmem:[%s5419_s1 + $0x5e4] ss:$16 sps:$4 sm:$0xff]  }
  0x80   :  { %1507 = vmatprep.subr.bf16.mxu0 %v3755_v5  ;;  %1671 = vmatprep.subr.bf16.mxu1 %v3758_v6  ;;  %v3848_v5 = vld [vmem:[%s5419_s1 + $0x5ec] ss:$16 sps:$4 sm:$0xff]   ;;  %v3843_v6 = vld [vmem:[%s5419_s1 + $0x5e0] ss:$16 sps:$4 sm:$0xff]  }
  0x82   :  { %1499 = vmatmul.mubr.bf16.vlgmr.msra.gmra.mrb[0].mxu0 %v3081_v7  ;;  %1663 = vmatmul.mubr.bf16.vlgmr.msra.gmra.mrb[0].mxu1 %v3081_v7  ;;  %v3846_v7 = vld [vmem:[%s5419_s1 + $0x5e8] ss:$16 sps:$4 sm:$0xff]  }
  0x83   :  { %1508 = vmatpush1.bf16.msra.mxu0 %v3753_v8  ;;  %1672 = vmatpush1.bf16.msra.mxu1 %v3756_v9  ;;  %v3853_v8 = vld [vmem:[%s5419_s1 + $0x604] ss:$16 sps:$4 sm:$0xff]   ;;  %v3856_v9 = vld [vmem:[%s5419_s1 + $0x60c] ss:$16 sps:$4 sm:$0xff]  }
  0x84   :  { %1509 = vmatprep.subr.bf16.mxu0 %v3761_v10  ;;  %1673 = vmatprep.subr.bf16.mxu1 %v3764_v12  ;;  %v3851_v10 = vld [vmem:[%s5419_s1 + $0x600] ss:$16 sps:$4 sm:$0xff]   ;;  %v3854_v12 = vld [vmem:[%s5419_s1 + $0x608] ss:$16 sps:$4 sm:$0xff]  }
  0x85   :  { %1539 = vmatprep.mubr.bf16.mxu0 %v3084_v13  ;;  %1703 = vmatprep.mubr.bf16.mxu1 %v3084_v13  ;;  %v3083_v13 = vcombine.low %v4604_v11, %v4604_v11  ;;  %v3860_v11 = vld [vmem:[%s5419_s1 + $0x628] ss:$16 sps:$4 sm:$0xff]  }
  0x87   :  { %1510 = vmatpush1.bf16.msra.mxu0 %v3759_v14  ;;  %1674 = vmatpush1.bf16.msra.mxu1 %v3762_v15  ;;  %v3859_v14 = vld [vmem:[%s5419_s1 + $0x624] ss:$16 sps:$4 sm:$0xff]   ;;  %v3862_v15 = vld [vmem:[%s5419_s1 + $0x62c] ss:$16 sps:$4 sm:$0xff]  }
  0x88   :  { %1511 = vmatprep.subr.bf16.mxu0 %v3767_v16  ;;  %1675 = vmatprep.subr.bf16.mxu1 %v3770_v17  ;;  %v3857_v16 = vld [vmem:[%s5419_s1 + $0x620] ss:$16 sps:$4 sm:$0xff]   ;;  %v3865_v17 = vld [vmem:[%s5419_s1 + $0x644] ss:$16 sps:$4 sm:$0xff]  }
  0x8b   :  { %1512 = vmatpush1.bf16.msra.mxu0 %v3765_v18  ;;  %1676 = vmatpush1.bf16.msra.mxu1 %v3768_v19  ;;  %v3868_v18 = vld [vmem:[%s5419_s1 + $0x64c] ss:$16 sps:$4 sm:$0xff]   ;;  %v3863_v19 = vld [vmem:[%s5419_s1 + $0x640] ss:$16 sps:$4 sm:$0xff]  }
  0x8c   :  { %1513 = vmatprep.subr.bf16.mxu0 %v3773_v20  ;;  %1677 = vmatprep.subr.bf16.mxu1 %v3776_v21  ;;  %v3866_v20 = vld [vmem:[%s5419_s1 + $0x648] ss:$16 sps:$4 sm:$0xff]   ;;  %v4148_v21 = vmov 0  }
  0x8f   :  { %1514 = vmatpush1.bf16.msra.mxu0 %v3771_v22  ;;  %1678 = vmatpush1.bf16.msra.mxu1 %v3774_v23  ;;  %v3871_v22 = vld [vmem:[%s5419_s1 + $0x664] ss:$16 sps:$4 sm:$0xff]   ;;  %v3874_v23 = vld [vmem:[%s5419_s1 + $0x66c] ss:$16 sps:$4 sm:$0xff]  }
  0x90   :  { %1515 = vmatprep.subr.bf16.mxu0 %v3779_v24  ;;  %1679 = vmatprep.subr.bf16.mxu1 %v3782_v25  ;;  %v3869_v24 = vld [vmem:[%s5419_s1 + $0x660] ss:$16 sps:$4 sm:$0xff]   ;;  %v3872_v25 = vld [vmem:[%s5419_s1 + $0x668] ss:$16 sps:$4 sm:$0xff]  }
  0x93   :  { %1516 = vmatpush1.bf16.msra.mxu0 %v3777_v26  ;;  %1680 = vmatpush1.bf16.msra.mxu1 %v3780_v27  ;;  %v3877_v26 = vld [vmem:[%s5419_s1 + $0x684] ss:$16 sps:$4 sm:$0xff]   ;;  %v3880_v27 = vld [vmem:[%s5419_s1 + $0x68c] ss:$16 sps:$4 sm:$0xff]  }
  0x94   :  { %1517 = vmatprep.subr.bf16.mxu0 %v3785_v28  ;;  %1681 = vmatprep.subr.bf16.mxu1 %v3788_v29  ;;  %v3875_v28 = vld [vmem:[%s5419_s1 + $0x680] ss:$16 sps:$4 sm:$0xff]   ;;  %v3878_v29 = vld [vmem:[%s5419_s1 + $0x688] ss:$16 sps:$4 sm:$0xff]  }
  0x97   :  { %1518 = vmatpush1.bf16.msra.mxu0 %v3783_v30  ;;  %1682 = vmatpush1.bf16.msra.mxu1 %v3786_v31  ;;  %v3883_v30 = vld [vmem:[%s5419_s1 + $0x6a4] ss:$16 sps:$4 sm:$0xff]   ;;  %v3886_v31 = vld [vmem:[%s5419_s1 + $0x6ac] ss:$16 sps:$4 sm:$0xff]  }
  0x98   :  { %1519 = vmatprep.subr.bf16.mxu0 %v3791_v32  ;;  %1683 = vmatprep.subr.bf16.mxu1 %v3794_v33  ;;  %v3881_v32 = vld [vmem:[%s5419_s1 + $0x6a0] ss:$16 sps:$4 sm:$0xff]   ;;  %v3884_v33 = vld [vmem:[%s5419_s1 + $0x6a8] ss:$16 sps:$4 sm:$0xff]  }
  0x9b   :  { %1520 = vmatpush1.bf16.msra.mxu0 %v3789_v34  ;;  %1684 = vmatpush1.bf16.msra.mxu1 %v3792_v35  ;;  %v3889_v34 = vld [vmem:[%s5419_s1 + $0x6c4] ss:$16 sps:$4 sm:$0xff]   ;;  %v3892_v35 = vld [vmem:[%s5419_s1 + $0x6cc] ss:$16 sps:$4 sm:$0xff]  }
  0x9c   :  { %1521 = vmatprep.subr.bf16.mxu0 %v3797_v36  ;;  %1685 = vmatprep.subr.bf16.mxu1 %v3800_v37  ;;  %v3887_v36 = vld [vmem:[%s5419_s1 + $0x6c0] ss:$16 sps:$4 sm:$0xff]   ;;  %v3890_v37 = vld [vmem:[%s5419_s1 + $0x6c8] ss:$16 sps:$4 sm:$0xff]  }
  0x9f   :  { %1522 = vmatpush1.bf16.msra.mxu0 %v3795_v38  ;;  %1686 = vmatpush1.bf16.msra.mxu1 %v3798_v39  ;;  %v3895_v38 = vld [vmem:[%s5419_s1 + $0x6e4] ss:$16 sps:$4 sm:$0xff]   ;;  %v3898_v39 = vld [vmem:[%s5419_s1 + $0x6ec] ss:$16 sps:$4 sm:$0xff]  }
  0xa0   :  { %1523 = vmatprep.subr.bf16.mxu0 %v3803_v40  ;;  %1687 = vmatprep.subr.bf16.mxu1 %v3806_v41  ;;  %v3893_v40 = vld [vmem:[%s5419_s1 + $0x6e0] ss:$16 sps:$4 sm:$0xff]   ;;  %v3896_v41 = vld [vmem:[%s5419_s1 + $0x6e8] ss:$16 sps:$4 sm:$0xff]  }
  0xa3   :  { %1524 = vmatpush1.bf16.msra.mxu0 %v3801_v42  ;;  %1688 = vmatpush1.bf16.msra.mxu1 %v3804_v43  ;;  %v3902_v42 = vld [vmem:[%s5421_s3 + $0x4] ss:$16 sps:$4 sm:$0xff]   ;;  %v3905_v43 = vld [vmem:[%s5421_s3 + $0xc] ss:$16 sps:$4 sm:$0xff]  }
  0xa4   :  { %1525 = vmatprep.subr.bf16.mxu0 %v3809_v44  ;;  %1689 = vmatprep.subr.bf16.mxu1 %v3812_v45  ;;  %v3899_v44 = vld [vmem:[%s5418_s0 + $0x18] ss:$0 sps:$4 sm:$0xff]   ;;  %v3900_v45 = vld [vmem:[%s5421_s3] ss:$16 sps:$4 sm:$0xff]  }
  0xa7   :  { %1526 = vmatpush1.bf16.msra.mxu0 %v3807_v46  ;;  %1690 = vmatpush1.bf16.msra.mxu1 %v3810_v47  ;;  %v3903_v46 = vld [vmem:[%s5421_s3 + $0x8] ss:$16 sps:$4 sm:$0xff]   ;;  %v3908_v47 = vld [vmem:[%s5421_s3 + $0x24] ss:$16 sps:$4 sm:$0xff]  }
  0xa8   :  { %1527 = vmatprep.subr.bf16.mxu0 %v3815_v48  ;;  %1691 = vmatprep.subr.bf16.mxu1 %v3818_v49  ;;  %v3911_v48 = vld [vmem:[%s5421_s3 + $0x2c] ss:$16 sps:$4 sm:$0xff]   ;;  %v3906_v49 = vld [vmem:[%s5421_s3 + $0x20] ss:$16 sps:$4 sm:$0xff]  }
  0xab   :  { %1528 = vmatpush1.bf16.msra.mxu0 %v3813_v50  ;;  %1692 = vmatpush1.bf16.msra.mxu1 %v3816_v51  ;;  %v3909_v50 = vld [vmem:[%s5421_s3 + $0x28] ss:$16 sps:$4 sm:$0xff]   ;;  %v3914_v51 = vld [vmem:[%s5421_s3 + $0x44] ss:$16 sps:$4 sm:$0xff]  }
  0xac   :  { %1529 = vmatprep.subr.bf16.mxu0 %v3821_v52  ;;  %1693 = vmatprep.subr.bf16.mxu1 %v3824_v53  ;;  %v3917_v52 = vld [vmem:[%s5421_s3 + $0x4c] ss:$16 sps:$4 sm:$0xff]   ;;  %v3912_v53 = vld [vmem:[%s5421_s3 + $0x40] ss:$16 sps:$4 sm:$0xff]  }
  0xaf   :  { %1530 = vmatpush1.bf16.msra.mxu0 %v3819_v54  ;;  %1694 = vmatpush1.bf16.msra.mxu1 %v3822_v55  ;;  %v3915_v54 = vld [vmem:[%s5421_s3 + $0x48] ss:$16 sps:$4 sm:$0xff]   ;;  %v3920_v55 = vld [vmem:[%s5421_s3 + $0x64] ss:$16 sps:$4 sm:$0xff]  }
  0xb0   :  { %1531 = vmatprep.subr.bf16.mxu0 %v3827_v56  ;;  %1695 = vmatprep.subr.bf16.mxu1 %v3830_v57  ;;  %v3923_v56 = vld [vmem:[%s5421_s3 + $0x6c] ss:$16 sps:$4 sm:$0xff]  }
  0xb3   :  { %1532 = vmatpush1.bf16.msra.mxu0 %v3825_v58  ;;  %1696 = vmatpush1.bf16.msra.mxu1 %v3828_v59 }
  0xb4   :  { %1533 = vmatprep.subr.bf16.mxu0 %v3833_v60  ;;  %1697 = vmatprep.subr.bf16.mxu1 %v3836_v61 }
  0xb7   :  { %1534 = vmatpush1.bf16.msra.mxu0 %v3831_v62  ;;  %1698 = vmatpush1.bf16.msra.mxu1 %v3834_v63 }
  0xb8   :  { %1535 = vmatprep.subr.bf16.mxu0 %v3839_v0  ;;  %1699 = vmatprep.subr.bf16.mxu1 %v3842_v1 }
  0xbb   :  { %1536 = vmatpush1.bf16.msra.mxu0 %v3837_v2  ;;  %1700 = vmatpush1.bf16.msra.mxu1 %v3840_v3 }
  0xbc   :  { %1537 = vmatprep.subr.bf16.mxu0 %v3845_v4  ;;  %1701 = vmatprep.subr.bf16.mxu1 %v3848_v5 }
  0xbf   :  { %1538 = vmatpush1.bf16.msra.mxu0 %v3843_v6  ;;  %1702 = vmatpush1.bf16.msra.mxu1 %v3846_v7 }
  0xc0   :  { %1548 = vmatprep.subr.bf16.mxu0 %v3853_v8  ;;  %1712 = vmatprep.subr.bf16.mxu1 %v3856_v9 }
  0xc2   :  { %1540 = vmatmul.mubr.bf16.vlgmr.msra.gmra.mrb[0].mxu0 %v3083_v13  ;;  %1704 = vmatmul.mubr.bf16.vlgmr.msra.gmra.mrb[0].mxu1 %v3083_v13 }
  0xc3   :  { %1549 = vmatpush1.bf16.msra.mxu0 %v3851_v10  ;;  %1713 = vmatpush1.bf16.msra.mxu1 %v3854_v12 }
  0xc4   :  { %1550 = vmatprep.subr.bf16.mxu0 %v3859_v14  ;;  %1714 = vmatprep.subr.bf16.mxu1 %v3862_v15 }
  0xc5   :  { %1580 = vmatprep.mubr.bf16.mxu0 %v4148_v21  ;;  %1744 = vmatprep.mubr.bf16.mxu1 %v4148_v21 }
  0xc7   :  { %1551 = vmatpush1.bf16.msra.mxu0 %v3857_v16  ;;  %1715 = vmatpush1.bf16.msra.mxu1 %v3860_v11 }
  0xc8   :  { %1552 = vmatprep.subr.bf16.mxu0 %v3865_v17  ;;  %1716 = vmatprep.subr.bf16.mxu1 %v3868_v18 }
  0xcb   :  { %1553 = vmatpush1.bf16.msra.mxu0 %v3863_v19  ;;  %1717 = vmatpush1.bf16.msra.mxu1 %v3866_v20 }
  0xcc   :  { %1554 = vmatprep.subr.bf16.mxu0 %v3871_v22  ;;  %1718 = vmatprep.subr.bf16.mxu1 %v3874_v23 }
  0xcf   :  { %1555 = vmatpush1.bf16.msra.mxu0 %v3869_v24  ;;  %1719 = vmatpush1.bf16.msra.mxu1 %v3872_v25 }
  0xd0   :  { %1556 = vmatprep.subr.bf16.mxu0 %v3877_v26  ;;  %1720 = vmatprep.subr.bf16.mxu1 %v3880_v27 }
  0xd3   :  { %1557 = vmatpush1.bf16.msra.mxu0 %v3875_v28  ;;  %1721 = vmatpush1.bf16.msra.mxu1 %v3878_v29 }
  0xd4   :  { %1558 = vmatprep.subr.bf16.mxu0 %v3883_v30  ;;  %1722 = vmatprep.subr.bf16.mxu1 %v3886_v31 }
  0xd7   :  { %1559 = vmatpush1.bf16.msra.mxu0 %v3881_v32  ;;  %1723 = vmatpush1.bf16.msra.mxu1 %v3884_v33 }
  0xd8   :  { %1560 = vmatprep.subr.bf16.mxu0 %v3889_v34  ;;  %1724 = vmatprep.subr.bf16.mxu1 %v3892_v35 }
  0xdb   :  { %1561 = vmatpush1.bf16.msra.mxu0 %v3887_v36  ;;  %1725 = vmatpush1.bf16.msra.mxu1 %v3890_v37 }
  0xdc   :  { %1562 = vmatprep.subr.bf16.mxu0 %v3895_v38  ;;  %1726 = vmatprep.subr.bf16.mxu1 %v3898_v39 }
  0xdf   :  { %1563 = vmatpush1.bf16.msra.mxu0 %v3893_v40  ;;  %1727 = vmatpush1.bf16.msra.mxu1 %v3896_v41 }
  0xe0   :  { %2550 = vmatprep.subr.bf16.mxu0 %v3902_v42  ;;  %2632 = vmatprep.subr.bf16.mxu1 %v3905_v43 }
  0xe2   :  { %1581 = vmatmul.mubr.bf16.vlgmr.msra.gmra.mrb[0].mxu0 %v3899_v44  ;;  %1745 = vmatmul.mubr.bf16.vlgmr.msra.gmra.mrb[0].mxu1 %v3899_v44 }
  0xe3   :  { %2551 = vmatpush1.bf16.msra.mxu0 %v3900_v45  ;;  %2633 = vmatpush1.bf16.msra.mxu1 %v3903_v46 }
  0xe4   :  { %2552 = vmatprep.subr.bf16.mxu0 %v3908_v47  ;;  %2634 = vmatprep.subr.bf16.mxu1 %v3911_v48 }
  0xe7   :  { %2553 = vmatpush1.bf16.msra.mxu0 %v3906_v49  ;;  %2635 = vmatpush1.bf16.msra.mxu1 %v3909_v50 }
  0xe8   :  { %2554 = vmatprep.subr.bf16.mxu0 %v3914_v51  ;;  %2636 = vmatprep.subr.bf16.mxu1 %v3917_v52 }
  0xe9   :  { %12 = vsyncpa [#allocation3], 0  ;;  %v3918_v57 = vld [vmem:[%s5421_s3 + $0x60] ss:$16 sps:$4 sm:$0xff]   ;;  %v3921_v58 = vld [vmem:[%s5421_s3 + $0x68] ss:$16 sps:$4 sm:$0xff]   ;;  %v260_v45 = vlaneseq }
  0xea   :  { %v3926_v59 = vld [vmem:[%s5421_s3 + $0x84] ss:$16 sps:$4 sm:$0xff]   ;;  %v3929_v60 = vld [vmem:[%s5421_s3 + $0x8c] ss:$16 sps:$4 sm:$0xff]   ;;  %v3924_v61 = vld [vmem:[%s5421_s3 + $0x80] ss:$16 sps:$4 sm:$0xff]  }
  0xeb   :  { %2555 = vmatpush1.bf16.msra.mxu0 %v3912_v53  ;;  %2637 = vmatpush1.bf16.msra.mxu1 %v3915_v54  ;;  %v3927_v62 = vld [vmem:[%s5421_s3 + $0x88] ss:$16 sps:$4 sm:$0xff]   ;;  %v3932_v63 = vld [vmem:[%s5421_s3 + $0xa4] ss:$16 sps:$4 sm:$0xff]   ;;  %v3935_v0 = vld [vmem:[%s5421_s3 + $0xac] ss:$16 sps:$4 sm:$0xff]  }
  0xec   :  { %2556 = vmatprep.subr.bf16.mxu0 %v3920_v55  ;;  %2638 = vmatprep.subr.bf16.mxu1 %v3923_v56  ;;  %v3930_v1 = vld [vmem:[%s5421_s3 + $0xa0] ss:$16 sps:$4 sm:$0xff]   ;;  %v3933_v2 = vld [vmem:[%s5421_s3 + $0xa8] ss:$16 sps:$4 sm:$0xff]   ;;  %v3938_v3 = vld [vmem:[%s5421_s3 + $0xc4] ss:$16 sps:$4 sm:$0xff]  }
  0xed   :  { %v3941_v4 = vld [vmem:[%s5421_s3 + $0xcc] ss:$16 sps:$4 sm:$0xff]   ;;  %v3936_v5 = vld [vmem:[%s5421_s3 + $0xc0] ss:$16 sps:$4 sm:$0xff]   ;;  %v3939_v6 = vld [vmem:[%s5421_s3 + $0xc8] ss:$16 sps:$4 sm:$0xff]  }
  0xee   :  { %v3944_v7 = vld [vmem:[%s5421_s3 + $0xe4] ss:$16 sps:$4 sm:$0xff]   ;;  %v3947_v8 = vld [vmem:[%s5421_s3 + $0xec] ss:$16 sps:$4 sm:$0xff]   ;;  %v3942_v9 = vld [vmem:[%s5421_s3 + $0xe0] ss:$16 sps:$4 sm:$0xff]  }
  0xef   :  { %2557 = vmatpush1.bf16.msra.mxu0 %v3918_v57  ;;  %2639 = vmatpush1.bf16.msra.mxu1 %v3921_v58  ;;  %v3945_v10 = vld [vmem:[%s5421_s3 + $0xe8] ss:$16 sps:$4 sm:$0xff]   ;;  %v3950_v12 = vld [vmem:[%s5421_s3 + $0x104] ss:$16 sps:$4 sm:$0xff]   ;;  %v3953_v13 = vld [vmem:[%s5421_s3 + $0x10c] ss:$16 sps:$4 sm:$0xff]  }
  0xf0   :  { %2558 = vmatprep.subr.bf16.mxu0 %v3926_v59  ;;  %2640 = vmatprep.subr.bf16.mxu1 %v3929_v60  ;;  %v3948_v14 = vld [vmem:[%s5421_s3 + $0x100] ss:$16 sps:$4 sm:$0xff]   ;;  %v3951_v15 = vld [vmem:[%s5421_s3 + $0x108] ss:$16 sps:$4 sm:$0xff]   ;;  %v3956_v16 = vld [vmem:[%s5421_s3 + $0x124] ss:$16 sps:$4 sm:$0xff]  }
  0xf1   :  { %v3959_v11 = vld [vmem:[%s5421_s3 + $0x12c] ss:$16 sps:$4 sm:$0xff]   ;;  %v3954_v17 = vld [vmem:[%s5421_s3 + $0x120] ss:$16 sps:$4 sm:$0xff]   ;;  %v3957_v18 = vld [vmem:[%s5421_s3 + $0x128] ss:$16 sps:$4 sm:$0xff]  }
  0xf2   :  { %v3962_v19 = vld [vmem:[%s5421_s3 + $0x144] ss:$16 sps:$4 sm:$0xff]   ;;  %v3965_v20 = vld [vmem:[%s5421_s3 + $0x14c] ss:$16 sps:$4 sm:$0xff]   ;;  %v3960_v21 = vld [vmem:[%s5421_s3 + $0x140] ss:$16 sps:$4 sm:$0xff]  }
  0xf3   :  { %2559 = vmatpush1.bf16.msra.mxu0 %v3924_v61  ;;  %2641 = vmatpush1.bf16.msra.mxu1 %v3927_v62  ;;  %v3963_v22 = vld [vmem:[%s5421_s3 + $0x148] ss:$16 sps:$4 sm:$0xff]   ;;  %v3968_v23 = vld [vmem:[%s5421_s3 + $0x164] ss:$16 sps:$4 sm:$0xff]   ;;  %v3971_v24 = vld [vmem:[%s5421_s3 + $0x16c] ss:$16 sps:$4 sm:$0xff]  }
  0xf4   :  { %2560 = vmatprep.subr.bf16.mxu0 %v3932_v63  ;;  %2642 = vmatprep.subr.bf16.mxu1 %v3935_v0  ;;  %v3966_v25 = vld [vmem:[%s5421_s3 + $0x160] ss:$16 sps:$4 sm:$0xff]   ;;  %v3969_v26 = vld [vmem:[%s5421_s3 + $0x168] ss:$16 sps:$4 sm:$0xff]   ;;  %v3974_v27 = vld [vmem:[%s5421_s3 + $0x184] ss:$16 sps:$4 sm:$0xff]  }
  0xf5   :  { %v3977_v28 = vld [vmem:[%s5421_s3 + $0x18c] ss:$16 sps:$4 sm:$0xff]   ;;  %v3972_v29 = vld [vmem:[%s5421_s3 + $0x180] ss:$16 sps:$4 sm:$0xff]   ;;  %v3975_v30 = vld [vmem:[%s5421_s3 + $0x188] ss:$16 sps:$4 sm:$0xff]  }
  0xf6   :  { %v3980_v31 = vld [vmem:[%s5421_s3 + $0x1a4] ss:$16 sps:$4 sm:$0xff]   ;;  %v3983_v32 = vld [vmem:[%s5421_s3 + $0x1ac] ss:$16 sps:$4 sm:$0xff]   ;;  %v3978_v33 = vld [vmem:[%s5421_s3 + $0x1a0] ss:$16 sps:$4 sm:$0xff]  }
  0xf7   :  { %2561 = vmatpush1.bf16.msra.mxu0 %v3930_v1  ;;  %2643 = vmatpush1.bf16.msra.mxu1 %v3933_v2  ;;  %v3981_v34 = vld [vmem:[%s5421_s3 + $0x1a8] ss:$16 sps:$4 sm:$0xff]   ;;  %v3986_v35 = vld [vmem:[%s5421_s3 + $0x1c4] ss:$16 sps:$4 sm:$0xff]   ;;  %v3989_v36 = vld [vmem:[%s5421_s3 + $0x1cc] ss:$16 sps:$4 sm:$0xff]  }
  0xf8   :  { %2562 = vmatprep.subr.bf16.mxu0 %v3938_v3  ;;  %2644 = vmatprep.subr.bf16.mxu1 %v3941_v4  ;;  %v3984_v37 = vld [vmem:[%s5421_s3 + $0x1c0] ss:$16 sps:$4 sm:$0xff]   ;;  %v3987_v38 = vld [vmem:[%s5421_s3 + $0x1c8] ss:$16 sps:$4 sm:$0xff]   ;;  %v3992_v39 = vld [vmem:[%s5421_s3 + $0x1e4] ss:$16 sps:$4 sm:$0xff]  }
  0xf9   :  { %v3995_v40 = vld [vmem:[%s5421_s3 + $0x1ec] ss:$16 sps:$4 sm:$0xff]   ;;  %v3990_v41 = vld [vmem:[%s5421_s3 + $0x1e0] ss:$16 sps:$4 sm:$0xff]   ;;  %v3993_v42 = vld [vmem:[%s5421_s3 + $0x1e8] ss:$16 sps:$4 sm:$0xff]  }
  0xfa   :  { %v3998_v43 = vld [vmem:[%s5421_s3 + $0x204] ss:$16 sps:$4 sm:$0xff]   ;;  %v4001_v44 = vld [vmem:[%s5421_s3 + $0x20c] ss:$16 sps:$4 sm:$0xff]   ;;  %v5084_v46 = vshrl.u32 %v260_v45, 7  ;;  %s4149_s8 = smov [#allocation2]  }
  0xfb   :  { %2563 = vmatpush1.bf16.msra.mxu0 %v3936_v5  ;;  %2645 = vmatpush1.bf16.msra.mxu1 %v3939_v6  ;;  %v5090_v48 = vld [vmem:[%s5420_s2] sm:$0xf]  ;;  %v3999_v6 = vld [vmem:[%s5421_s3 + $0x208] ss:$16 sps:$4 sm:$0xff]   ;;  %v4058_v45 = vld [vmem:[%s5421_s3 + $0x344] ss:$16 sps:$4 sm:$0xff]  }
  0xfc   :  { %2564 = vmatprep.subr.bf16.mxu0 %v3944_v7  ;;  %2646 = vmatprep.subr.bf16.mxu1 %v3947_v8  ;;  %v262_v47 = vsub.s32 0, %v5084_v46  ;;  %v266_v49 = vsub.s32 1, %v5084_v46  ;;  %v274_v50 = vsub.s32 3, %v5084_v46  ;;  %v3996_v5 = vld [vmem:[%s5421_s3 + $0x200] ss:$16 sps:$4 sm:$0xff]   ;;  %s3071_s9 = sshll.u32 %s4149_s8, 4  ;;  %s3072_s9 = int_to_ptr.vmem [resolvable:$true] %s3071_s9 }
  0xfd   :  { %v4004_v8 = vld [vmem:[%s5421_s3 + $0x224] ss:$16 sps:$4 sm:$0xff]   ;;  %s4124_s10 = scalar_lea.vmem %s3072_s9, 128  ;;  %p4129_p1 = scmp.lt.s32.totalorder %s3072_s9, %s3072_s9 }
  0xfe   :  { %v263_v51 = vrot.slane %v5090_v48, %v262_v47  ;;  %v267_v52 = vrot.slane %v5090_v48, %v266_v49  ;;  %v275_v53 = vrot.slane %v5090_v48, %v274_v50  ;;  %p4125_p0 = scmp.ne.s32.totalorder %s3072_s9, %s4124_s10  ;;  %p4130_p2 = scmp.lt.s32.totalorder %s4124_s10, %s4124_s10 }
  0xff   :  { %2565 = vmatpush1.bf16.msra.mxu0 %v3942_v9  ;;  %2647 = vmatpush1.bf16.msra.mxu1 %v3945_v10  ;;  %v4007_v9 = vld [vmem:[%s5421_s3 + $0x22c] ss:$16 sps:$4 sm:$0xff]  }
 0x100   :  { %2566 = vmatprep.subr.bf16.mxu0 %v3950_v12  ;;  %2648 = vmatprep.subr.bf16.mxu1 %v3953_v13  ;;  %v4002_v12 = vld [vmem:[%s5421_s3 + $0x220] ss:$16 sps:$4 sm:$0xff]   ;;  %v4005_v13 = vld [vmem:[%s5421_s3 + $0x228] ss:$16 sps:$4 sm:$0xff]   ;;  %p4131_p3 = por %p4130_p2, %p4129_p1 }
 0x102   :  { %p4132_p4 = pnand %p4131_p3, %p4125_p0 }
 0x103   :  { %2567 = vmatpush1.bf16.msra.mxu0 %v3948_v14  ;;  %2649 = vmatpush1.bf16.msra.mxu1 %v3951_v15  ;;  %v4010_v14 = vld [vmem:[%s5421_s3 + $0x244] ss:$16 sps:$4 sm:$0xff]   ;;  %v4013_v15 = vld [vmem:[%s5421_s3 + $0x24c] ss:$16 sps:$4 sm:$0xff]  }
 0x104   :  { %2568 = vmatprep.subr.bf16.mxu0 %v3956_v16  ;;  %2650 = vmatprep.subr.bf16.mxu1 %v3959_v11  ;;  %v4008_v16 = vld [vmem:[%s5421_s3 + $0x240] ss:$16 sps:$4 sm:$0xff]   ;;  %v4011_v11 = vld [vmem:[%s5421_s3 + $0x248] ss:$16 sps:$4 sm:$0xff]  }
 0x107   :  { %2569 = vmatpush1.bf16.msra.mxu0 %v3954_v17  ;;  %2651 = vmatpush1.bf16.msra.mxu1 %v3957_v18  ;;  %v4016_v17 = vld [vmem:[%s5421_s3 + $0x264] ss:$16 sps:$4 sm:$0xff]   ;;  %v4019_v18 = vld [vmem:[%s5421_s3 + $0x26c] ss:$16 sps:$4 sm:$0xff]  }
 0x108   :  { %2570 = vmatprep.subr.bf16.mxu0 %v3962_v19  ;;  %2652 = vmatprep.subr.bf16.mxu1 %v3965_v20  ;;  %v4014_v19 = vld [vmem:[%s5421_s3 + $0x260] ss:$16 sps:$4 sm:$0xff]   ;;  %v4017_v20 = vld [vmem:[%s5421_s3 + $0x268] ss:$16 sps:$4 sm:$0xff]  }
 0x10b   :  { %2571 = vmatpush1.bf16.msra.mxu0 %v3960_v21  ;;  %2653 = vmatpush1.bf16.msra.mxu1 %v3963_v22  ;;  %v4022_v21 = vld [vmem:[%s5421_s3 + $0x284] ss:$16 sps:$4 sm:$0xff]   ;;  %v4025_v22 = vld [vmem:[%s5421_s3 + $0x28c] ss:$16 sps:$4 sm:$0xff]  }
 0x10c   :  { %2572 = vmatprep.subr.bf16.mxu0 %v3968_v23  ;;  %2654 = vmatprep.subr.bf16.mxu1 %v3971_v24  ;;  %v4020_v23 = vld [vmem:[%s5421_s3 + $0x280] ss:$16 sps:$4 sm:$0xff]   ;;  %v4023_v24 = vld [vmem:[%s5421_s3 + $0x288] ss:$16 sps:$4 sm:$0xff]  }
 0x10f   :  { %2573 = vmatpush1.bf16.msra.mxu0 %v3966_v25  ;;  %2655 = vmatpush1.bf16.msra.mxu1 %v3969_v26  ;;  %v4028_v25 = vld [vmem:[%s5421_s3 + $0x2a4] ss:$16 sps:$4 sm:$0xff]   ;;  %v4031_v26 = vld [vmem:[%s5421_s3 + $0x2ac] ss:$16 sps:$4 sm:$0xff]  }
 0x110   :  { %2574 = vmatprep.subr.bf16.mxu0 %v3974_v27  ;;  %2656 = vmatprep.subr.bf16.mxu1 %v3977_v28  ;;  %v4026_v27 = vld [vmem:[%s5421_s3 + $0x2a0] ss:$16 sps:$4 sm:$0xff]   ;;  %v4029_v28 = vld [vmem:[%s5421_s3 + $0x2a8] ss:$16 sps:$4 sm:$0xff]  }
 0x113   :  { %2575 = vmatpush1.bf16.msra.mxu0 %v3972_v29  ;;  %2657 = vmatpush1.bf16.msra.mxu1 %v3975_v30  ;;  %v4034_v29 = vld [vmem:[%s5421_s3 + $0x2c4] ss:$16 sps:$4 sm:$0xff]   ;;  %v4037_v30 = vld [vmem:[%s5421_s3 + $0x2cc] ss:$16 sps:$4 sm:$0xff]  }
 0x114   :  { %2576 = vmatprep.subr.bf16.mxu0 %v3980_v31  ;;  %2658 = vmatprep.subr.bf16.mxu1 %v3983_v32  ;;  %v4032_v31 = vld [vmem:[%s5421_s3 + $0x2c0] ss:$16 sps:$4 sm:$0xff]   ;;  %v4035_v32 = vld [vmem:[%s5421_s3 + $0x2c8] ss:$16 sps:$4 sm:$0xff]  }
 0x117   :  { %2577 = vmatpush1.bf16.msra.mxu0 %v3978_v33  ;;  %2659 = vmatpush1.bf16.msra.mxu1 %v3981_v34  ;;  %v4040_v33 = vld [vmem:[%s5421_s3 + $0x2e4] ss:$16 sps:$4 sm:$0xff]   ;;  %v4043_v34 = vld [vmem:[%s5421_s3 + $0x2ec] ss:$16 sps:$4 sm:$0xff]  }
 0x118   :  { %2578 = vmatprep.subr.bf16.mxu0 %v3986_v35  ;;  %2660 = vmatprep.subr.bf16.mxu1 %v3989_v36  ;;  %v4038_v35 = vld [vmem:[%s5421_s3 + $0x2e0] ss:$16 sps:$4 sm:$0xff]   ;;  %v4041_v36 = vld [vmem:[%s5421_s3 + $0x2e8] ss:$16 sps:$4 sm:$0xff]  }
 0x11b   :  { %2579 = vmatpush1.bf16.msra.mxu0 %v3984_v37  ;;  %2661 = vmatpush1.bf16.msra.mxu1 %v3987_v38  ;;  %v4046_v37 = vld [vmem:[%s5421_s3 + $0x304] ss:$16 sps:$4 sm:$0xff]   ;;  %v4049_v38 = vld [vmem:[%s5421_s3 + $0x30c] ss:$16 sps:$4 sm:$0xff]  }
 0x11c   :  { %2580 = vmatprep.subr.bf16.mxu0 %v3992_v39  ;;  %2662 = vmatprep.subr.bf16.mxu1 %v3995_v40  ;;  %v4044_v39 = vld [vmem:[%s5421_s3 + $0x300] ss:$16 sps:$4 sm:$0xff]   ;;  %v4047_v40 = vld [vmem:[%s5421_s3 + $0x308] ss:$16 sps:$4 sm:$0xff]  }
 0x11f   :  { %2581 = vmatpush1.bf16.msra.mxu0 %v3990_v41  ;;  %2663 = vmatpush1.bf16.msra.mxu1 %v3993_v42  ;;  %v4052_v41 = vld [vmem:[%s5421_s3 + $0x324] ss:$16 sps:$4 sm:$0xff]   ;;  %v4055_v42 = vld [vmem:[%s5421_s3 + $0x32c] ss:$16 sps:$4 sm:$0xff]  }
 0x120   :  { %2591 = vmatprep.subr.bf16.mxu0 %v3998_v43  ;;  %2673 = vmatprep.subr.bf16.mxu1 %v4001_v44  ;;  %v4050_v43 = vld [vmem:[%s5421_s3 + $0x320] ss:$16 sps:$4 sm:$0xff]   ;;  %v4053_v44 = vld [vmem:[%s5421_s3 + $0x328] ss:$16 sps:$4 sm:$0xff]  }
 0x1b5   :  { %v1582_v54 = vpop.f32.mrb[0].mxu0  ;;  %v5103_v55 = vpop.f32.mrb[0].mxu1 }
 0x1b6   :  { %v3515_v56 = vadd.f32 %v1582_v54, %v263_v51  ;;  %v1584_v57 = vpop.f32.mrb[1].mxu0  ;;  %v1748_v58 = vpop.f32.mrb[1].mxu1  ;;  %v4061_v51 = vld [vmem:[%s5421_s3 + $0x34c] ss:$16 sps:$4 sm:$0xff]   ;;  %v4064_v54 = vld [vmem:[%s5421_s3 + $0x364] ss:$16 sps:$4 sm:$0xff]  }
 0x1b7   :  { %v3516_v59 = vadd.f32 %v1584_v57, %v267_v52  ;;  %v3518_v60 = vadd.f32 %v1748_v58, %v275_v53  ;;  %v1586_v61 = vpop.f32.mrb[2].mxu0  ;;  %v1750_v62 = vpop.f32.mrb[2].mxu1  ;;  %v4056_v52 = vld [vmem:[%s5421_s3 + $0x340] ss:$16 sps:$4 sm:$0xff]   ;;  %v4059_v53 = vld [vmem:[%s5421_s3 + $0x348] ss:$16 sps:$4 sm:$0xff]  }
 0x1b8   :  { %v1753_v63 = vmax.f32 %v3515_v56, 0.0  ;;  %v1587_v0 = vpop.f32.mrb[3].mxu0  ;;  %v1751_v1 = vpop.f32.mrb[3].mxu1  ;;  %v4067_v56 = vld [vmem:[%s5421_s3 + $0x36c] ss:$16 sps:$4 sm:$0xff]  }
 0x1b9   :  { %v1754_v2 = vmax.f32 %v3516_v59, 0.0  ;;  %v1756_v3 = vmax.f32 %v3518_v60, 0.0  ;;  %v4062_v57 = vld [vmem:[%s5421_s3 + $0x360] ss:$16 sps:$4 sm:$0xff]   ;;  %v4065_v58 = vld [vmem:[%s5421_s3 + $0x368] ss:$16 sps:$4 sm:$0xff]  }
 0x1ba   :  { %v1757_v7 = vpack.c.bf16 %v1753_v63, %v1753_v63  ;;  %v4070_v59 = vld [vmem:[%s5421_s3 + $0x384] ss:$16 sps:$4 sm:$0xff]   ;;  %v4073_v60 = vld [vmem:[%s5421_s3 + $0x38c] ss:$16 sps:$4 sm:$0xff]   ;;  %v4068_v61 = vld [vmem:[%s5421_s3 + $0x380] ss:$16 sps:$4 sm:$0xff]  }
 0x1bb   :  { %v1758_v4 = vpack.c.bf16 %v1754_v2, %v1754_v2  ;;  %v1760_v10 = vpack.c.bf16 %v1756_v3, %v1756_v3  ;;  %v4071_v62 = vld [vmem:[%s5421_s3 + $0x388] ss:$16 sps:$4 sm:$0xff]   ;;  %v270_v63 = vsub.s32 2, %v5084_v46  ;;  %v4076_v0 = vld [vmem:[%s5421_s3 + $0x3a4] ss:$16 sps:$4 sm:$0xff]  }
 0x1bc   :  { %v4079_v1 = vld [vmem:[%s5421_s3 + $0x3ac] ss:$16 sps:$4 sm:$0xff]   ;;  %v4074_v2 = vld [vmem:[%s5421_s3 + $0x3a0] ss:$16 sps:$4 sm:$0xff]   ;;  %v4077_v3 = vld [vmem:[%s5421_s3 + $0x3a8] ss:$16 sps:$4 sm:$0xff]  }
 0x1bd   :  { %2582 = vmatprep.mubr.bf16.mxu0 %v1758_v4  ;;  %2664 = vmatprep.mubr.bf16.mxu1 %v1758_v4  ;;  %v271_v4 = vrot.slane %v5090_v48, %v270_v63  ;;  %v4083_v48 = vld [vmem:[%s5421_s3 + $0x3c8] ss:$16 sps:$4 sm:$0xff]  }
 0x1be   :  { %2583 = vmatmul.mubr.bf16.vlgmr.msra.gmra.mrb[4].mxu0 %v1757_v7  ;;  %2665 = vmatmul.mubr.bf16.vlgmr.msra.gmra.mrb[4].mxu1 %v1757_v7  ;;  %v4080_v7 = vld [vmem:[%s5421_s3 + $0x3c0] ss:$16 sps:$4 sm:$0xff]  }
 0x1bf   :  { %2592 = vmatpush1.bf16.msra.mxu0 %v3996_v5  ;;  %2674 = vmatpush1.bf16.msra.mxu1 %v3999_v6  ;;  %v4082_v5 = vld [vmem:[%s5421_s3 + $0x3c4] ss:$16 sps:$4 sm:$0xff]   ;;  %v4085_v6 = vld [vmem:[%s5421_s3 + $0x3cc] ss:$16 sps:$4 sm:$0xff]  }
 0x1c0   :  { %2623 = vmatprep.mubr.bf16.mxu0 %v1760_v10  ;;  %2705 = vmatprep.mubr.bf16.mxu1 %v1760_v10  ;;  %v4091_v10 = vld [vmem:[%s5421_s3 + $0x3ec] ss:$16 sps:$4 sm:$0xff]  }
 0x1c1   :  { %2593 = vmatprep.subr.bf16.mxu0 %v4004_v8  ;;  %2675 = vmatprep.subr.bf16.mxu1 %v4007_v9  ;;  %v3517_v8 = vadd.f32 %v5103_v55, %v271_v4  ;;  %v4088_v9 = vld [vmem:[%s5421_s3 + $0x3e4] ss:$16 sps:$4 sm:$0xff]   ;;  %v4089_v55 = vld [vmem:[%s5421_s3 + $0x3e8] ss:$16 sps:$4 sm:$0xff]  }
 0x1c3   :  { %2594 = vmatpush1.bf16.msra.mxu0 %v4002_v12  ;;  %2676 = vmatpush1.bf16.msra.mxu1 %v4005_v13  ;;  %v4086_v12 = vld [vmem:[%s5421_s3 + $0x3e0] ss:$16 sps:$4 sm:$0xff]   ;;  %v1755_v13 = vmax.f32 %v3517_v8, 0.0 }
 0x1c4   :  { %2595 = vmatprep.subr.bf16.mxu0 %v4010_v14  ;;  %2677 = vmatprep.subr.bf16.mxu1 %v4013_v15  ;;  %v4092_v14 = vld [vmem:[%s5423_s5 + $0x40] sm:$0xff]  }
 0x1c5   :  { %v4093_v15 = vld [vmem:[%s5423_s5 + $0xc0] sm:$0xff]  }
 0x1c7   :  { %2596 = vmatpush1.bf16.msra.mxu0 %v4008_v16  ;;  %2678 = vmatpush1.bf16.msra.mxu1 %v4011_v11  ;;  %v4094_v16 = vld [vmem:[%s5423_s5] sm:$0xff]  }
 0x1c8   :  { %2597 = vmatprep.subr.bf16.mxu0 %v4016_v17  ;;  %2679 = vmatprep.subr.bf16.mxu1 %v4019_v18  ;;  %v4095_v11 = vld [vmem:[%s5423_s5 + $0x80] sm:$0xff]   ;;  %v1759_v17 = vpack.c.bf16 %v1755_v13, %v1755_v13  ;;  %v4096_v18 = vld [vmem:[%s5423_s5 + $0x48] sm:$0xff]  }
 0x1cb   :  { %2598 = vmatpush1.bf16.msra.mxu0 %v4014_v19  ;;  %2680 = vmatpush1.bf16.msra.mxu1 %v4017_v20  ;;  %v4097_v19 = vld [vmem:[%s5423_s5 + $0xc8] sm:$0xff]  }
 0x1cc   :  { %2599 = vmatprep.subr.bf16.mxu0 %v4022_v21  ;;  %2681 = vmatprep.subr.bf16.mxu1 %v4025_v22  ;;  %v4098_v20 = vld [vmem:[%s5423_s5 + $0x8] sm:$0xff]   ;;  %v4100_v22 = vld [vmem:[%s5423_s5 + $0x50] sm:$0xff]  }
 0x1cd   :  { %v4099_v21 = vld [vmem:[%s5423_s5 + $0x88] sm:$0xff]  }
 0x1cf   :  { %2600 = vmatpush1.bf16.msra.mxu0 %v4020_v23  ;;  %2682 = vmatpush1.bf16.msra.mxu1 %v4023_v24  ;;  %v4101_v23 = vld [vmem:[%s5423_s5 + $0xd0] sm:$0xff]  }
 0x1d0   :  { %2601 = vmatprep.subr.bf16.mxu0 %v4028_v25  ;;  %2683 = vmatprep.subr.bf16.mxu1 %v4031_v26  ;;  %v4102_v24 = vld [vmem:[%s5423_s5 + $0x10] sm:$0xff]   ;;  %v4104_v26 = vld [vmem:[%s5423_s5 + $0x58] sm:$0xff]  }
 0x1d1   :  { %v4103_v25 = vld [vmem:[%s5423_s5 + $0x90] sm:$0xff]  }
 0x1d3   :  { %2602 = vmatpush1.bf16.msra.mxu0 %v4026_v27  ;;  %2684 = vmatpush1.bf16.msra.mxu1 %v4029_v28  ;;  %v4105_v27 = vld [vmem:[%s5423_s5 + $0xd8] sm:$0xff]  }
 0x1d4   :  { %2603 = vmatprep.subr.bf16.mxu0 %v4034_v29  ;;  %2685 = vmatprep.subr.bf16.mxu1 %v4037_v30  ;;  %v4106_v28 = vld [vmem:[%s5423_s5 + $0x18] sm:$0xff]   ;;  %v4108_v30 = vld [vmem:[%s5423_s5 + $0x60] sm:$0xff]  }
 0x1d5   :  { %v4107_v29 = vld [vmem:[%s5423_s5 + $0x98] sm:$0xff]  }
 0x1d7   :  { %2604 = vmatpush1.bf16.msra.mxu0 %v4032_v31  ;;  %2686 = vmatpush1.bf16.msra.mxu1 %v4035_v32  ;;  %v4109_v31 = vld [vmem:[%s5423_s5 + $0xe0] sm:$0xff]  }
 0x1d8   :  { %2605 = vmatprep.subr.bf16.mxu0 %v4040_v33  ;;  %2687 = vmatprep.subr.bf16.mxu1 %v4043_v34  ;;  %v4110_v32 = vld [vmem:[%s5423_s5 + $0x20] sm:$0xff]   ;;  %v4112_v34 = vld [vmem:[%s5423_s5 + $0x68] sm:$0xff]  }
 0x1d9   :  { %v4111_v33 = vld [vmem:[%s5423_s5 + $0xa0] sm:$0xff]  }
 0x1db   :  { %2606 = vmatpush1.bf16.msra.mxu0 %v4038_v35  ;;  %2688 = vmatpush1.bf16.msra.mxu1 %v4041_v36  ;;  %v4113_v35 = vld [vmem:[%s5423_s5 + $0xe8] sm:$0xff]  }
 0x1dc   :  { %2607 = vmatprep.subr.bf16.mxu0 %v4046_v37  ;;  %2689 = vmatprep.subr.bf16.mxu1 %v4049_v38  ;;  %v4114_v36 = vld [vmem:[%s5423_s5 + $0x28] sm:$0xff]   ;;  %v4116_v38 = vld [vmem:[%s5423_s5 + $0x70] sm:$0xff]  }
 0x1dd   :  { %v4115_v37 = vld [vmem:[%s5423_s5 + $0xa8] sm:$0xff]  }
 0x1df   :  { %2608 = vmatpush1.bf16.msra.mxu0 %v4044_v39  ;;  %2690 = vmatpush1.bf16.msra.mxu1 %v4047_v40  ;;  %v4117_v39 = vld [vmem:[%s5423_s5 + $0xf0] sm:$0xff]  }
 0x1e0   :  { %2609 = vmatprep.subr.bf16.mxu0 %v4052_v41  ;;  %2691 = vmatprep.subr.bf16.mxu1 %v4055_v42  ;;  %v4118_v40 = vld [vmem:[%s5423_s5 + $0x30] sm:$0xff]   ;;  %v4120_v42 = vld [vmem:[%s5423_s5 + $0x78] sm:$0xff]  }
 0x1e1   :  { %v4119_v41 = vld [vmem:[%s5423_s5 + $0xb0] sm:$0xff]  }
 0x1e3   :  { %2610 = vmatpush1.bf16.msra.mxu0 %v4050_v43  ;;  %2692 = vmatpush1.bf16.msra.mxu1 %v4053_v44  ;;  %v4121_v43 = vld [vmem:[%s5423_s5 + $0xf8] sm:$0xff]  }
 0x1e4   :  { %2611 = vmatprep.subr.bf16.mxu0 %v4058_v45  ;;  %2693 = vmatprep.subr.bf16.mxu1 %v4061_v51  ;;  %v4122_v44 = vld [vmem:[%s5423_s5 + $0x38] sm:$0xff]   ;;  %v29_v51 = vld [vmem:[%s5422_s4] sm:$0xf] }
 0x1e5   :  { %v4123_v45 = vld [vmem:[%s5423_s5 + $0xb8] sm:$0xff]  }
 0x1e7   :  { %2612 = vmatpush1.bf16.msra.mxu0 %v4056_v52  ;;  %2694 = vmatpush1.bf16.msra.mxu1 %v4059_v53  ;;  %v1893_v52 = vrot.slane %v29_v51, %v262_v47  ;;  %v1901_v53 = vrot.slane %v29_v51, %v270_v63 }
 0x1e8   :  { %2613 = vmatprep.subr.bf16.mxu0 %v4064_v54  ;;  %2695 = vmatprep.subr.bf16.mxu1 %v4067_v56  ;;  %v1897_v54 = vrot.slane %v29_v51, %v266_v49  ;;  %v1905_v56 = vrot.slane %v29_v51, %v274_v50 }
 0x1eb   :  { %2614 = vmatpush1.bf16.msra.mxu0 %v4062_v57  ;;  %2696 = vmatpush1.bf16.msra.mxu1 %v4065_v58 }
 0x1ec   :  { %2615 = vmatprep.subr.bf16.mxu0 %v4070_v59  ;;  %2697 = vmatprep.subr.bf16.mxu1 %v4073_v60 }
 0x1ef   :  { %2616 = vmatpush1.bf16.msra.mxu0 %v4068_v61  ;;  %2698 = vmatpush1.bf16.msra.mxu1 %v4071_v62 }
 0x1f0   :  { %2617 = vmatprep.subr.bf16.mxu0 %v4076_v0  ;;  %2699 = vmatprep.subr.bf16.mxu1 %v4079_v1 }
 0x1f3   :  { %2618 = vmatpush1.bf16.msra.mxu0 %v4074_v2  ;;  %2700 = vmatpush1.bf16.msra.mxu1 %v4077_v3 }
 0x1f4   :  { %2619 = vmatprep.subr.bf16.mxu0 %v4082_v5  ;;  %2701 = vmatprep.subr.bf16.mxu1 %v4085_v6 }
 0x1f7   :  { %2620 = vmatpush1.bf16.msra.mxu0 %v4080_v7  ;;  %2702 = vmatpush1.bf16.msra.mxu1 %v4083_v48 }
 0x1f8   :  { %2621 = vmatprep.subr.bf16.mxu0 %v4088_v9  ;;  %2703 = vmatprep.subr.bf16.mxu1 %v4091_v10  ;;  %v3438_v10 = vld [vmem:[%s5424_s6] ss:$0 sm:$0xff] }
 0x1fb   :  { %2622 = vmatpush1.bf16.msra.mxu0 %v4086_v12  ;;  %2704 = vmatpush1.bf16.msra.mxu1 %v4089_v55 }
 0x1fc   :  { %3471 = vmatprep.subr.bf16.mxu0 %v4092_v14  ;;  %3493 = vmatprep.subr.bf16.mxu1 %v4093_v15 }
 0x1fe   :  { %2624 = vmatmul.mubr.bf16.vlgmr.msra.gmra.mrb[4].mxu0 %v1759_v17  ;;  %2706 = vmatmul.mubr.bf16.vlgmr.msra.gmra.mrb[4].mxu1 %v1759_v17 }
 0x1ff   :  { %3472 = vmatpush3.bf16.msra.mxu0 %v4094_v16  ;;  %3494 = vmatpush3.bf16.msra.mxu1 %v4095_v11 }
 0x200   :  { %3473 = vmatprep.subr.bf16.mxu0 %v4096_v18  ;;  %3495 = vmatprep.subr.bf16.mxu1 %v4097_v19 }
 0x203   :  { %3474 = vmatpush3.bf16.msra.mxu0 %v4098_v20  ;;  %3496 = vmatpush3.bf16.msra.mxu1 %v4099_v21 }
 0x204   :  { %3475 = vmatprep.subr.bf16.mxu0 %v4100_v22  ;;  %3497 = vmatprep.subr.bf16.mxu1 %v4101_v23 }
 0x207   :  { %3476 = vmatpush3.bf16.msra.mxu0 %v4102_v24  ;;  %3498 = vmatpush3.bf16.msra.mxu1 %v4103_v25 }
 0x208   :  { %3477 = vmatprep.subr.bf16.mxu0 %v4104_v26  ;;  %3499 = vmatprep.subr.bf16.mxu1 %v4105_v27 }
 0x20b   :  { %3478 = vmatpush3.bf16.msra.mxu0 %v4106_v28  ;;  %3500 = vmatpush3.bf16.msra.mxu1 %v4107_v29 }
 0x20c   :  { %3479 = vmatprep.subr.bf16.mxu0 %v4108_v30  ;;  %3501 = vmatprep.subr.bf16.mxu1 %v4109_v31 }
 0x20f   :  { %3480 = vmatpush3.bf16.msra.mxu0 %v4110_v32  ;;  %3502 = vmatpush3.bf16.msra.mxu1 %v4111_v33 }
 0x210   :  { %3481 = vmatprep.subr.bf16.mxu0 %v4112_v34  ;;  %3503 = vmatprep.subr.bf16.mxu1 %v4113_v35 }
 0x213   :  { %3482 = vmatpush3.bf16.msra.mxu0 %v4114_v36  ;;  %3504 = vmatpush3.bf16.msra.mxu1 %v4115_v37 }
 0x214   :  { %3483 = vmatprep.subr.bf16.mxu0 %v4116_v38  ;;  %3505 = vmatprep.subr.bf16.mxu1 %v4117_v39 }
 0x217   :  { %3484 = vmatpush3.bf16.msra.mxu0 %v4118_v40  ;;  %3506 = vmatpush3.bf16.msra.mxu1 %v4119_v41 }
 0x218   :  { %3485 = vmatprep.subr.bf16.mxu0 %v4120_v42  ;;  %3507 = vmatprep.subr.bf16.mxu1 %v4121_v43 }
 0x21b   :  { %3486 = vmatpush3.bf16.msra.mxu0 %v4122_v44  ;;  %3508 = vmatpush3.bf16.msra.mxu1 %v4123_v45 }
 0x2d1   :  { %v2625_v57 = vpop.f32.mrb[4].mxu0  ;;  %v2707_v58 = vpop.f32.mrb[4].mxu1 }
 0x2d2   :  { %v3519_v59 = vadd.f32 %v2625_v57, %v1893_v52  ;;  %v3521_v60 = vadd.f32 %v2707_v58, %v1901_v53  ;;  %v2627_v61 = vpop.f32.mrb[5].mxu0  ;;  %v2709_v62 = vpop.f32.mrb[5].mxu1 }
 0x2d3   :  { %v3520_v0 = vadd.f32 %v2627_v61, %v1897_v54  ;;  %v3522_v1 = vadd.f32 %v2709_v62, %v1905_v56  ;;  %v2629_v2 = vpop.f32.mrb[6].mxu0  ;;  %v2711_v3 = vpop.f32.mrb[6].mxu1 }
 0x2d4   :  { %v2714_v47 = vmax.f32 %v3519_v59, 0.0  ;;  %v2716_v4 = vmax.f32 %v3521_v60, 0.0  ;;  %v2630_v5 = vpop.f32.mrb[7].mxu0  ;;  %v2712_v63 = vpop.f32.mrb[7].mxu1 }
 0x2d5   :  { %v2715_v6 = vmax.f32 %v3520_v0, 0.0  ;;  %v2717_v7 = vmax.f32 %v3522_v1, 0.0 }
 0x2d6   :  { %v2718_v46 = vpack.c.bf16 %v2714_v47, %v2714_v47  ;;  %v2720_v50 = vpack.c.bf16 %v2716_v4, %v2716_v4 }
 0x2d7   :  { %v2719_v49 = vpack.c.bf16 %v2715_v6, %v2715_v6  ;;  %v2721_v48 = vpack.c.bf16 %v2717_v7, %v2717_v7 }
 0x2d9   :  { %3016 = vmatprep.mubr.bf16.mxu0 %v2719_v49  ;;  %3056 = vmatprep.mubr.bf16.mxu1 %v2721_v48 }
 0x2da   :  { %3017 = vmatmul.mubr.bf16.vlgmr.msra.gmra.mrb[8].mxu0 %v2718_v46  ;;  %3057 = vmatmul.mubr.bf16.vlgmr.msra.gmra.mrb[8].mxu1 %v2720_v50 }
 0x3ad   :  { %v3487_v8 = vpop.f32.mrb[8].mxu0  ;;  %v3509_v9 = vpop.f32.mrb[8].mxu1 }
 0x3ae   :  { %v3488_v12 = vpop.f32.mrb[9].mxu0  ;;  %v3510_v55 = vpop.f32.mrb[9].mxu1 }
 0x3af   :  { %v3489_v13 = vadd.f32 %v3488_v12, %v3487_v8  ;;  %v3511_v14 = vadd.f32 %v3510_v55, %v3509_v9  ;;  %v3490_v15 = vpop.f32.mrb[10].mxu0  ;;  %v3512_v16 = vpop.f32.mrb[10].mxu1 }
 0x3b0   :  { %v3491_v11 = vpop.f32.mrb[11].mxu0  ;;  %v3513_v17 = vpop.f32.mrb[11].mxu1 }
 0x3b1   :  { %v3019_v18 = vadd.f32 %v3489_v13, %v3438_v10 }
 0x3b3   :  { %v3059_v19 = vadd.f32 %v3511_v14, %v3019_v18 }
 0x3b5   :  { %3064 = vst [vmem:[#allocation2] sm:$0xff] %v3059_v19 }
 0x3b6   :  { %4135 = shalt.err (!%p4132_p4)
}
 0x3b7   :  { %s4136_s12 = scalar_lea.hbm %s5425_s7, 128 }
 0x3b8   :  { %p4137_p5 = scmp.ne.s32.totalorder %s5425_s7, %s4136_s12  ;;  %p4140_p6 = scmp.lt.u32.totalorder %s4136_s12, %s5425_s7 }
 0x3ba   :  { %p4142_p7 = pnand %p4140_p6, %p4137_p5 }
 0x3bc   :  { %4145 = shalt.err (!%p4142_p7)
}
 0x3bd   :  { %3074 = dma.vmem_to_hbm [thread:$0]  %s3072_s9, 128, %s5425_s7, [#allocation3]  }
 0x3be   :  { %4146 = dma.done.wait [#allocation3], 128  }
 0x3bf   :  { %4147 = vsyncadd [#allocation3], 4294967168 }
 0x3c0   :  { %3078 = vsyncpa [#allocation3], 1 }

</bundles_post_ra>
